<compile_context>
chip_gen: v6e
topology: v6e:2x2x1
jax: 0.10.0
libtpu: 0.0.40
codegen_flags: <defaults>
</compile_context>

<pallas_src>
import functools

import numpy as np
import jax
import jax.numpy as jnp
from jax import lax
from jax.experimental import pallas as pl
from jax.experimental.pallas import tpu as pltpu


def graph_grad_np(adj):
    """numpy port of STDEN.graph_grad: (num_nodes, num_edges) incidence-like matrix."""
    num_nodes = adj.shape[0]
    num_edges = int((adj > 0.0).sum())
    grad = np.zeros((num_nodes, num_edges), dtype=np.float32)
    e = 0
    for i in range(num_nodes):
        for j in range(num_nodes):
            if adj[i, j] == 0:
                continue
            grad[i, e] = 1.0
            grad[j, e] = -1.0
            e += 1
    return grad


def _sigmoid(v):
    # tanh form: one EUP op, no exp overflow for large |v|.
    return 0.5 * (jnp.tanh(0.5 * v) + 1.0)


def _encoder_z0_kernel(x_ref, wih_ref, bih_ref, whh_ref, bhh_ref,
                       gT_ref, w1_ref, b1_ref, w2_ref, b2_ref,
                       zout_ref, agg_ref, *, T, D, HP):
    """One grid step = (batch b, edge-tile et).

    x_ref:   (tile_E, T*D)   bf16  GRU inputs for this batch/edge tile, time-packed
    wih_ref: (D, 3*HP)       bf16  fused input->gate weights, per-gate 128-lane padded
    whh_ref: (HP, 3*HP)      bf16  fused hidden->gate weights
    bih/bhh: (1, 3*HP)       f32   fused gate biases
    gT_ref:  (N, tile_E)     bf16  0.5 * |incidence|^T tile for this edge tile
    w1/b1:   (HP, P1)/(1,P1)       head layer 1 (padded, bf16 weights / f32 bias)
    w2/b2:   (P1, P2)/(1,P2)       head layer 2 (mean|std pre-abs, padded)
    zout_ref:(N, P2)         f32   lane-dense output slab for batch b
    agg_ref: (N, HP)         f32   per-batch aggregation accumulator (scratch)
    """
    et = pl.program_id(1)

    @pl.when(et == 0)
    def _init():
        agg_ref[...] = jnp.zeros_like(agg_ref)

    tile_e = x_ref.shape[0]
    x = x_ref[...]
    wih = wih_ref[...]
    whh = whh_ref[...]
    bih = bih_ref[...]
    bhh = bhh_ref[...]

    h = jnp.zeros((tile_e, HP), jnp.float32)
    for t in range(T):  # T small & static -> full unroll for scheduler visibility
        xt = x[:, t * D:(t + 1) * D]                                 # (tile_e, D)
        # TODO(synk): if the K=D=2 projection ever shows MXU-slot-bound, switch
        # it to two VPU broadcast-FMAs instead of an MXU dot.
        gi = jnp.dot(xt, wih, preferred_element_type=jnp.float32) + bih
        gh = jnp.dot(h.astype(jnp.bfloat16), whh,
                     preferred_element_type=jnp.float32) + bhh
        rz = _sigmoid(gi[:, :2 * HP] + gh[:, :2 * HP])               # fused r|z
        r = rz[:, :HP]
        z = rz[:, HP:]
        n = jnp.tanh(gi[:, 2 * HP:] + r * gh[:, 2 * HP:])
        h = (1.0 - z) * n + z * h

    # Per-batch graph aggregation, accumulated over edge tiles.
    agg_ref[...] += jnp.dot(gT_ref[...], h.astype(jnp.bfloat16),
                            preferred_element_type=jnp.float32)

    @pl.when(et == pl.num_programs(1) - 1)
    def _head():
        hid = jnp.tanh(jnp.dot(agg_ref[...].astype(jnp.bfloat16), w1_ref[...],
                               preferred_element_type=jnp.float32) + b1_ref[...])
        zout_ref[...] = jnp.dot(hid.astype(jnp.bfloat16), w2_ref[...],
                                preferred_element_type=jnp.float32) + b2_ref[...]


def _pick_tile_e(E, target=512):
    """Edge-tile size: a multiple of 128 dividing E (lane-dense gT tiles),
    otherwise the full (small) edge dim."""
    if E % 128 == 0:
        t = min(target - target % 128, E)
        while t > 128 and E % t:
            t -= 128
        return max(t, 128)
    return E


def encoder_z0_forward(inputs, adj, params, input_dim, rnn_units, latent_dim):
    """inputs: (num_his, batch, num_edges * input_dim) -> (mean, std), each
    shaped (1, batch, latent_dim * num_nodes), matching the PyTorch module."""
    w_ih, w_hh, b_ih, b_hh, w1, b1, w2, b2 = params
    T, B, _ = inputs.shape
    D = input_dim
    H = rnn_units
    L = latent_dim
    f32, bf16 = jnp.float32, jnp.bfloat16

    grad = graph_grad_np(np.asarray(adj))            # (N, E)
    N, E = grad.shape
    inv_grad = grad.T.copy()                         # (E, N)
    inv_grad[inv_grad != 0.0] = 0.5
    invgT = np.ascontiguousarray(inv_grad.T)         # (N, E)

    # Per-gate 128-lane padded, fused GRU weights (torch gate order r, z, n).
    HP = pl.cdiv(H, 128) * 128
    GP = 3 * HP
    w_ih_np = np.asarray(w_ih, np.float32)
    w_hh_np = np.asarray(w_hh, np.float32)
    b_ih_np = np.asarray(b_ih, np.float32)
    b_hh_np = np.asarray(b_hh, np.float32)
    wih_p = np.zeros((D, GP), np.float32)
    whh_p = np.zeros((HP, GP), np.float32)
    bih_p = np.zeros((1, GP), np.float32)
    bhh_p = np.zeros((1, GP), np.float32)
    for g in range(3):
        wih_p[:, g * HP:g * HP + H] = w_ih_np[g * H:(g + 1) * H, :].T
        whh_p[:H, g * HP:g * HP + H] = w_hh_np[g * H:(g + 1) * H, :].T
        bih_p[0, g * HP:g * HP + H] = b_ih_np[g * H:(g + 1) * H]
        bhh_p[0, g * HP:g * HP + H] = b_hh_np[g * H:(g + 1) * H]

    # Padded hiddens_to_z0 head: Linear(H, 50) -> Tanh -> Linear(50, 2L).
    Hmid = w1.shape[0]
    P1 = pl.cdiv(Hmid, 128) * 128
    P2 = pl.cdiv(2 * L, 128) * 128
    w1_p = np.zeros((HP, P1), np.float32)
    w1_p[:H, :Hmid] = np.asarray(w1, np.float32).T
    b1_p = np.zeros((1, P1), np.float32)
    b1_p[0, :Hmid] = np.asarray(b1, np.float32)
    w2_p = np.zeros((P1, P2), np.float32)
    w2_p[:Hmid, :2 * L] = np.asarray(w2, np.float32).T
    b2_p = np.zeros((1, P2), np.float32)
    b2_p[0, :2 * L] = np.asarray(b2, np.float32)

    # Lane-packed GRU input: (B, E, T*D) so each row tile is one contiguous block.
    x = (inputs.reshape(T, B, E, D).transpose(1, 2, 0, 3)
         .reshape(B, E, T * D).astype(bf16))

    tile_E = _pick_tile_e(E)
    n_et = E // tile_E
    TD = T * D

    args = (x,
            jnp.asarray(wih_p, bf16), jnp.asarray(bih_p, f32),
            jnp.asarray(whh_p, bf16), jnp.asarray(bhh_p, f32),
            jnp.asarray(invgT, bf16),
            jnp.asarray(w1_p, bf16), jnp.asarray(b1_p, f32),
            jnp.asarray(w2_p, bf16), jnp.asarray(b2_p, f32))

    const = lambda b, et: (0, 0)
    in_specs = [
        pl.BlockSpec((None, tile_E, TD), lambda b, et: (b, et, 0)),   # x
        pl.BlockSpec((D, GP), const),                                 # wih
        pl.BlockSpec((1, GP), const),                                 # bih
        pl.BlockSpec((HP, GP), const),                                # whh
        pl.BlockSpec((1, GP), const),                                 # bhh
        pl.BlockSpec((N, tile_E), lambda b, et: (0, et)),             # invgT tile
        pl.BlockSpec((HP, P1), const),                                # w1
        pl.BlockSpec((1, P1), const),                                 # b1
        pl.BlockSpec((P1, P2), const),                                # w2
        pl.BlockSpec((1, P2), const),                                 # b2
    ]

    flops = 2 * (T * B * E * D * GP + T * B * E * HP * GP
                 + B * N * E * HP + B * N * HP * P1 + B * N * P1 * P2)
    transcendentals = T * B * E * 3 * HP + B * N * P1
    bytes_accessed = (int(x.size) * 2
                      + sum(int(a.size) * a.dtype.itemsize for a in args[1:])
                      + B * N * P2 * 4)

    kernel = functools.partial(_encoder_z0_kernel, T=T, D=D, HP=HP)
    zout = pl.pallas_call(
        kernel,
        out_shape=jax.ShapeDtypeStruct((B, N, P2), f32),
        grid=(B, n_et),
        in_specs=in_specs,
        out_specs=pl.BlockSpec((None, N, P2), lambda b, et: (b, 0, 0)),
        scratch_shapes=[pltpu.VMEM((N, HP), f32)],
        compiler_params=pltpu.CompilerParams(
            dimension_semantics=("parallel", "arbitrary"),
            vmem_limit_bytes=64 * 1024 * 1024),
        cost_estimate=pl.CostEstimate(
            flops=int(flops),
            transcendentals=int(transcendentals),
            bytes_accessed=int(bytes_accessed)),
    )(*args)                                                          # (B, N, P2)

    mean = zout[:, :, :L].reshape(B, N * L)
    std = jnp.abs(zout[:, :, L:2 * L]).reshape(B, N * L)
    return mean[None], std[None]


def reference_forward(inputs, adj, params, input_dim, rnn_units, latent_dim):
    """Pure-JAX f32 emulation of the PyTorch module (for correctness check)."""
    w_ih, w_hh, b_ih, b_hh, w1, b1, w2, b2 = params
    T, B, _ = inputs.shape
    H = rnn_units
    L = latent_dim

    grad = graph_grad_np(np.asarray(adj))
    N, E = grad.shape
    inv_grad = grad.T.copy()
    inv_grad[inv_grad != 0.0] = 0.5
    inv_grad = jnp.asarray(inv_grad)                 # (E, N)

    x = inputs.reshape(T, B, E, input_dim).reshape(T, B * E, input_dim)

    def step(h, x_t):
        gi = x_t @ w_ih.T + b_ih
        gh = h @ w_hh.T + b_hh
        r = _sigmoid(gi[:, :H] + gh[:, :H])
        z = _sigmoid(gi[:, H:2 * H] + gh[:, H:2 * H])
        n = jnp.tanh(gi[:, 2 * H:] + r * gh[:, 2 * H:])
        return (1.0 - z) * n + z * h, None

    h_last, _ = lax.scan(step, jnp.zeros((B * E, H), jnp.float32), x)
    last = h_last.reshape(B, E, H)
    agg = jnp.einsum('beh,en->bnh', last, inv_grad)
    hid = jnp.tanh(agg @ w1.T + b1)
    zout = hid @ w2.T + b2
    mean = zout[..., :L].reshape(B, -1)
    std = jnp.abs(zout[..., L:]).reshape(B, -1)
    return mean[None], std[None]


if __name__ == "__main__":
    # Small, module-consistent shapes.
    adj = np.array([[0, 1, 0, 1],
                    [1, 0, 1, 0],
                    [0, 1, 0, 1],
                    [1, 0, 1, 0]], dtype=np.float32)   # 4 nodes, 8 directed edges
    num_nodes = adj.shape[0]
    num_edges = int((adj > 0.0).sum())

    T = 8            # num_his
    B = 2            # batch_size
    D = 2            # input_dim
    H = 32           # rnn_units
    L = 8            # latent_dim

    key = jax.random.PRNGKey(0)
    keys = jax.random.split(key, 8)
    scale = 0.1
    # GRU parameters (PyTorch layout: weight_ih (3H, D), weight_hh (3H, H), gate order r,z,n)
    w_ih = scale * jax.random.normal(keys[0], (3 * H, D), dtype=jnp.float32)
    w_hh = scale * jax.random.normal(keys[1], (3 * H, H), dtype=jnp.float32)
    b_ih = scale * jax.random.normal(keys[2], (3 * H,), dtype=jnp.float32)
    b_hh = scale * jax.random.normal(keys[3], (3 * H,), dtype=jnp.float32)
    # hiddens_to_z0: Linear(H, 50) -> Tanh -> Linear(50, 2L), init_network_weights(std=0.1, bias=0)
    w1 = scale * jax.random.normal(keys[4], (50, H), dtype=jnp.float32)
    b1 = jnp.zeros((50,), dtype=jnp.float32)
    w2 = scale * jax.random.normal(keys[5], (2 * L, 50), dtype=jnp.float32)
    b2 = jnp.zeros((2 * L,), dtype=jnp.float32)
    params = (w_ih, w_hh, b_ih, b_hh, w1, b1, w2, b2)

    inputs = jax.random.normal(keys[6], (T, B, num_edges * D), dtype=jnp.float32)

    mean, std = encoder_z0_forward(inputs, adj, params, D, H, L)
    jax.block_until_ready((mean, std))

    mean_ref, std_ref = reference_forward(inputs, adj, params, D, H, L)
    assert mean.shape == (1, B, num_nodes * L) and std.shape == (1, B, num_nodes * L)
    # Tolerances account for bf16 matmul operands in the kernel (f32 accumulation).
    np.testing.assert_allclose(np.asarray(mean), np.asarray(mean_ref), rtol=2e-2, atol=2e-2)
    np.testing.assert_allclose(np.asarray(std), np.asarray(std_ref), rtol=2e-2, atol=2e-2)
    assert not np.isnan(np.asarray(mean)).any()
    assert not np.isnan(np.asarray(std)).any()

    print("KERNEL_OK")
</pallas_src>

<mosaic_0001>
module attributes {stable_mosaic.version = 11 : i64} {
  func.func @_encoder_z0_kernel(%arg0: i32, %arg1: i32, %arg2: memref<1x8x16xbf16, #tpu.memory_space<vmem>>, %arg3: memref<2x384xbf16, #tpu.memory_space<vmem>>, %arg4: memref<1x384xf32, #tpu.memory_space<vmem>>, %arg5: memref<128x384xbf16, #tpu.memory_space<vmem>>, %arg6: memref<1x384xf32, #tpu.memory_space<vmem>>, %arg7: memref<4x8xbf16, #tpu.memory_space<vmem>>, %arg8: memref<128x128xbf16, #tpu.memory_space<vmem>>, %arg9: memref<1x128xf32, #tpu.memory_space<vmem>>, %arg10: memref<128x128xbf16, #tpu.memory_space<vmem>>, %arg11: memref<1x128xf32, #tpu.memory_space<vmem>>, %arg12: memref<1x4x128xf32, #tpu.memory_space<vmem>>, %arg13: memref<4x128xf32, #tpu.memory_space<vmem>>) attributes {dimension_semantics = [#tpu.dimension_semantics<parallel>, #tpu.dimension_semantics<arbitrary>], iteration_bounds = array<i64: 2, 1>, scalar_prefetch = 0 : i64, scratch_operands = 1 : i64, tpu.core_type = #tpu.core_type<tc>, window_params = [{transform_indices = @transform_0, window_bounds = array<i64: 1, 8, 16>}, {pipeline_mode = #tpu.pipeline_mode<synchronous>, transform_indices = @transform_1, window_bounds = array<i64: 2, 384>}, {pipeline_mode = #tpu.pipeline_mode<synchronous>, transform_indices = @transform_2, window_bounds = array<i64: 1, 384>}, {pipeline_mode = #tpu.pipeline_mode<synchronous>, transform_indices = @transform_3, window_bounds = array<i64: 128, 384>}, {pipeline_mode = #tpu.pipeline_mode<synchronous>, transform_indices = @transform_4, window_bounds = array<i64: 1, 384>}, {transform_indices = @transform_5, window_bounds = array<i64: 4, 8>}, {pipeline_mode = #tpu.pipeline_mode<synchronous>, transform_indices = @transform_6, window_bounds = array<i64: 128, 128>}, {pipeline_mode = #tpu.pipeline_mode<synchronous>, transform_indices = @transform_7, window_bounds = array<i64: 1, 128>}, {pipeline_mode = #tpu.pipeline_mode<synchronous>, transform_indices = @transform_8, window_bounds = array<i64: 128, 128>}, {pipeline_mode = #tpu.pipeline_mode<synchronous>, transform_indices = @transform_9, window_bounds = array<i64: 1, 128>}, {transform_indices = @transform_10, window_bounds = array<i64: 1, 4, 128>}]} {
    %c0_i32 = arith.constant 0 : i32
    %0 = arith.cmpi eq, %arg1, %c0_i32 : i32
    %1 = arith.extui %0 : i1 to i32
    %c0_i32_0 = arith.constant 0 : i32
    %2 = arith.cmpi ne, %1, %c0_i32_0 : i32
    scf.if %2 {
      %cst_68 = arith.constant 0.000000e+00 : f32
      %259 = vector.broadcast %cst_68 : f32 to vector<4x128xf32>
      %c0_69 = arith.constant 0 : index
      %c0_70 = arith.constant 0 : index
      %260 = vector.load %arg13[%c0_69, %c0_70] : memref<4x128xf32, #tpu.memory_space<vmem>>, vector<4x128xf32>
      tpu.vector_store %arg13[%c0_69, %c0_70], %259 {strides = array<i32>} : memref<4x128xf32, #tpu.memory_space<vmem>>, vector<4x128xf32>,
    } else {
    }
    %c0 = arith.constant 0 : index
    %c0_1 = arith.constant 0 : index
    %c0_2 = arith.constant 0 : index
    %3 = vector.load %arg2[%c0, %c0_1, %c0_2] : memref<1x8x16xbf16, #tpu.memory_space<vmem>>, vector<1x8x16xbf16>
    %4 = vector.shape_cast %3 : vector<1x8x16xbf16> to vector<8x16xbf16>
    %c0_3 = arith.constant 0 : index
    %c0_4 = arith.constant 0 : index
    %5 = vector.load %arg3[%c0_3, %c0_4] : memref<2x384xbf16, #tpu.memory_space<vmem>>, vector<2x384xbf16>
    %c0_5 = arith.constant 0 : index
    %c0_6 = arith.constant 0 : index
    %6 = vector.load %arg5[%c0_5, %c0_6] : memref<128x384xbf16, #tpu.memory_space<vmem>>, vector<128x384xbf16>
    %c0_7 = arith.constant 0 : index
    %c0_8 = arith.constant 0 : index
    %7 = vector.load %arg4[%c0_7, %c0_8] : memref<1x384xf32, #tpu.memory_space<vmem>>, vector<1x384xf32>
    %c0_9 = arith.constant 0 : index
    %c0_10 = arith.constant 0 : index
    %8 = vector.load %arg6[%c0_9, %c0_10] : memref<1x384xf32, #tpu.memory_space<vmem>>, vector<1x384xf32>
    %cst = arith.constant 0.000000e+00 : f32
    %9 = vector.broadcast %cst : f32 to vector<8x128xf32>
    %10 = vector.extract_strided_slice %4 {offsets = [0, 0], sizes = [8, 2], strides = [1, 1]} : vector<8x16xbf16> to vector<8x2xbf16>
    %cst_11 = arith.constant dense<0.000000e+00> : vector<8x384xf32>
    %11 = tpu.matmul %10, %5, %cst_11 {dimension_numbers = #tpu.dot_dimension_numbers<[1], [0], [0], [1], [0, 0, 1, 1], [], []>} : vector<8x2xbf16>, vector<2x384xbf16>, vector<8x384xf32> -> vector<8x384xf32>
    %12 = vector.broadcast %7 : vector<1x384xf32> to vector<8x384xf32>
    %13 = arith.addf %11, %12 : vector<8x384xf32>
    %14 = arith.truncf %9 : vector<8x128xf32> to vector<8x128xbf16>
    %cst_12 = arith.constant dense<0.000000e+00> : vector<8x384xf32>
    %15 = tpu.matmul %14, %6, %cst_12 {dimension_numbers = #tpu.dot_dimension_numbers<[1], [0], [0], [1], [0, 0, 1, 1], [], []>} : vector<8x128xbf16>, vector<128x384xbf16>, vector<8x384xf32> -> vector<8x384xf32>
    %16 = vector.broadcast %8 : vector<1x384xf32> to vector<8x384xf32>
    %17 = arith.addf %15, %16 : vector<8x384xf32>
    %18 = vector.extract_strided_slice %13 {offsets = [0, 0], sizes = [8, 256], strides = [1, 1]} : vector<8x384xf32> to vector<8x256xf32>
    %19 = vector.extract_strided_slice %17 {offsets = [0, 0], sizes = [8, 256], strides = [1, 1]} : vector<8x384xf32> to vector<8x256xf32>
    %20 = arith.addf %18, %19 : vector<8x256xf32>
    %cst_13 = arith.constant 5.000000e-01 : f32
    %21 = vector.broadcast %cst_13 : f32 to vector<8x256xf32>
    %22 = arith.mulf %21, %20 : vector<8x256xf32>
    %23 = math.tanh %22 : vector<8x256xf32>
    %cst_14 = arith.constant 1.000000e+00 : f32
    %24 = vector.broadcast %cst_14 : f32 to vector<8x256xf32>
    %25 = arith.addf %23, %24 : vector<8x256xf32>
    %cst_15 = arith.constant 5.000000e-01 : f32
    %26 = vector.broadcast %cst_15 : f32 to vector<8x256xf32>
    %27 = arith.mulf %26, %25 : vector<8x256xf32>
    %28 = vector.extract_strided_slice %27 {offsets = [0, 0], sizes = [8, 128], strides = [1, 1]} : vector<8x256xf32> to vector<8x128xf32>
    %29 = vector.extract_strided_slice %27 {offsets = [0, 128], sizes = [8, 128], strides = [1, 1]} : vector<8x256xf32> to vector<8x128xf32>
    %30 = vector.extract_strided_slice %13 {offsets = [0, 256], sizes = [8, 128], strides = [1, 1]} : vector<8x384xf32> to vector<8x128xf32>
    %31 = vector.extract_strided_slice %17 {offsets = [0, 256], sizes = [8, 128], strides = [1, 1]} : vector<8x384xf32> to vector<8x128xf32>
    %32 = arith.mulf %28, %31 : vector<8x128xf32>
    %33 = arith.addf %30, %32 : vector<8x128xf32>
    %34 = math.tanh %33 : vector<8x128xf32>
    %cst_16 = arith.constant 1.000000e+00 : f32
    %35 = vector.broadcast %cst_16 : f32 to vector<8x128xf32>
    %36 = arith.subf %35, %29 : vector<8x128xf32>
    %37 = arith.mulf %36, %34 : vector<8x128xf32>
    %38 = arith.mulf %29, %9 : vector<8x128xf32>
    %39 = arith.addf %37, %38 : vector<8x128xf32>
    %40 = vector.extract_strided_slice %4 {offsets = [0, 2], sizes = [8, 2], strides = [1, 1]} : vector<8x16xbf16> to vector<8x2xbf16>
    %cst_17 = arith.constant dense<0.000000e+00> : vector<8x384xf32>
    %41 = tpu.matmul %40, %5, %cst_17 {dimension_numbers = #tpu.dot_dimension_numbers<[1], [0], [0], [1], [0, 0, 1, 1], [], []>} : vector<8x2xbf16>, vector<2x384xbf16>, vector<8x384xf32> -> vector<8x384xf32>
    %42 = vector.broadcast %7 : vector<1x384xf32> to vector<8x384xf32>
    %43 = arith.addf %41, %42 : vector<8x384xf32>
    %44 = arith.truncf %39 : vector<8x128xf32> to vector<8x128xbf16>
    %cst_18 = arith.constant dense<0.000000e+00> : vector<8x384xf32>
    %45 = tpu.matmul %44, %6, %cst_18 {dimension_numbers = #tpu.dot_dimension_numbers<[1], [0], [0], [1], [0, 0, 1, 1], [], []>} : vector<8x128xbf16>, vector<128x384xbf16>, vector<8x384xf32> -> vector<8x384xf32>
    %46 = vector.broadcast %8 : vector<1x384xf32> to vector<8x384xf32>
    %47 = arith.addf %45, %46 : vector<8x384xf32>
    %48 = vector.extract_strided_slice %43 {offsets = [0, 0], sizes = [8, 256], strides = [1, 1]} : vector<8x384xf32> to vector<8x256xf32>
    %49 = vector.extract_strided_slice %47 {offsets = [0, 0], sizes = [8, 256], strides = [1, 1]} : vector<8x384xf32> to vector<8x256xf32>
    %50 = arith.addf %48, %49 : vector<8x256xf32>
    %cst_19 = arith.constant 5.000000e-01 : f32
    %51 = vector.broadcast %cst_19 : f32 to vector<8x256xf32>
    %52 = arith.mulf %51, %50 : vector<8x256xf32>
    %53 = math.tanh %52 : vector<8x256xf32>
    %cst_20 = arith.constant 1.000000e+00 : f32
    %54 = vector.broadcast %cst_20 : f32 to vector<8x256xf32>
    %55 = arith.addf %53, %54 : vector<8x256xf32>
    %cst_21 = arith.constant 5.000000e-01 : f32
    %56 = vector.broadcast %cst_21 : f32 to vector<8x256xf32>
    %57 = arith.mulf %56, %55 : vector<8x256xf32>
    %58 = vector.extract_strided_slice %57 {offsets = [0, 0], sizes = [8, 128], strides = [1, 1]} : vector<8x256xf32> to vector<8x128xf32>
    %59 = vector.extract_strided_slice %57 {offsets = [0, 128], sizes = [8, 128], strides = [1, 1]} : vector<8x256xf32> to vector<8x128xf32>
    %60 = vector.extract_strided_slice %43 {offsets = [0, 256], sizes = [8, 128], strides = [1, 1]} : vector<8x384xf32> to vector<8x128xf32>
    %61 = vector.extract_strided_slice %47 {offsets = [0, 256], sizes = [8, 128], strides = [1, 1]} : vector<8x384xf32> to vector<8x128xf32>
    %62 = arith.mulf %58, %61 : vector<8x128xf32>
    %63 = arith.addf %60, %62 : vector<8x128xf32>
    %64 = math.tanh %63 : vector<8x128xf32>
    %cst_22 = arith.constant 1.000000e+00 : f32
    %65 = vector.broadcast %cst_22 : f32 to vector<8x128xf32>
    %66 = arith.subf %65, %59 : vector<8x128xf32>
    %67 = arith.mulf %66, %64 : vector<8x128xf32>
    %68 = arith.mulf %59, %39 : vector<8x128xf32>
    %69 = arith.addf %67, %68 : vector<8x128xf32>
    %70 = vector.extract_strided_slice %4 {offsets = [0, 4], sizes = [8, 2], strides = [1, 1]} : vector<8x16xbf16> to vector<8x2xbf16>
    %cst_23 = arith.constant dense<0.000000e+00> : vector<8x384xf32>
    %71 = tpu.matmul %70, %5, %cst_23 {dimension_numbers = #tpu.dot_dimension_numbers<[1], [0], [0], [1], [0, 0, 1, 1], [], []>} : vector<8x2xbf16>, vector<2x384xbf16>, vector<8x384xf32> -> vector<8x384xf32>
    %72 = vector.broadcast %7 : vector<1x384xf32> to vector<8x384xf32>
    %73 = arith.addf %71, %72 : vector<8x384xf32>
    %74 = arith.truncf %69 : vector<8x128xf32> to vector<8x128xbf16>
    %cst_24 = arith.constant dense<0.000000e+00> : vector<8x384xf32>
    %75 = tpu.matmul %74, %6, %cst_24 {dimension_numbers = #tpu.dot_dimension_numbers<[1], [0], [0], [1], [0, 0, 1, 1], [], []>} : vector<8x128xbf16>, vector<128x384xbf16>, vector<8x384xf32> -> vector<8x384xf32>
    %76 = vector.broadcast %8 : vector<1x384xf32> to vector<8x384xf32>
    %77 = arith.addf %75, %76 : vector<8x384xf32>
    %78 = vector.extract_strided_slice %73 {offsets = [0, 0], sizes = [8, 256], strides = [1, 1]} : vector<8x384xf32> to vector<8x256xf32>
    %79 = vector.extract_strided_slice %77 {offsets = [0, 0], sizes = [8, 256], strides = [1, 1]} : vector<8x384xf32> to vector<8x256xf32>
    %80 = arith.addf %78, %79 : vector<8x256xf32>
    %cst_25 = arith.constant 5.000000e-01 : f32
    %81 = vector.broadcast %cst_25 : f32 to vector<8x256xf32>
    %82 = arith.mulf %81, %80 : vector<8x256xf32>
    %83 = math.tanh %82 : vector<8x256xf32>
    %cst_26 = arith.constant 1.000000e+00 : f32
    %84 = vector.broadcast %cst_26 : f32 to vector<8x256xf32>
    %85 = arith.addf %83, %84 : vector<8x256xf32>
    %cst_27 = arith.constant 5.000000e-01 : f32
    %86 = vector.broadcast %cst_27 : f32 to vector<8x256xf32>
    %87 = arith.mulf %86, %85 : vector<8x256xf32>
    %88 = vector.extract_strided_slice %87 {offsets = [0, 0], sizes = [8, 128], strides = [1, 1]} : vector<8x256xf32> to vector<8x128xf32>
    %89 = vector.extract_strided_slice %87 {offsets = [0, 128], sizes = [8, 128], strides = [1, 1]} : vector<8x256xf32> to vector<8x128xf32>
    %90 = vector.extract_strided_slice %73 {offsets = [0, 256], sizes = [8, 128], strides = [1, 1]} : vector<8x384xf32> to vector<8x128xf32>
    %91 = vector.extract_strided_slice %77 {offsets = [0, 256], sizes = [8, 128], strides = [1, 1]} : vector<8x384xf32> to vector<8x128xf32>
    %92 = arith.mulf %88, %91 : vector<8x128xf32>
    %93 = arith.addf %90, %92 : vector<8x128xf32>
    %94 = math.tanh %93 : vector<8x128xf32>
    %cst_28 = arith.constant 1.000000e+00 : f32
    %95 = vector.broadcast %cst_28 : f32 to vector<8x128xf32>
    %96 = arith.subf %95, %89 : vector<8x128xf32>
    %97 = arith.mulf %96, %94 : vector<8x128xf32>
    %98 = arith.mulf %89, %69 : vector<8x128xf32>
    %99 = arith.addf %97, %98 : vector<8x128xf32>
    %100 = vector.extract_strided_slice %4 {offsets = [0, 6], sizes = [8, 2], strides = [1, 1]} : vector<8x16xbf16> to vector<8x2xbf16>
    %cst_29 = arith.constant dense<0.000000e+00> : vector<8x384xf32>
    %101 = tpu.matmul %100, %5, %cst_29 {dimension_numbers = #tpu.dot_dimension_numbers<[1], [0], [0], [1], [0, 0, 1, 1], [], []>} : vector<8x2xbf16>, vector<2x384xbf16>, vector<8x384xf32> -> vector<8x384xf32>
    %102 = vector.broadcast %7 : vector<1x384xf32> to vector<8x384xf32>
    %103 = arith.addf %101, %102 : vector<8x384xf32>
    %104 = arith.truncf %99 : vector<8x128xf32> to vector<8x128xbf16>
    %cst_30 = arith.constant dense<0.000000e+00> : vector<8x384xf32>
    %105 = tpu.matmul %104, %6, %cst_30 {dimension_numbers = #tpu.dot_dimension_numbers<[1], [0], [0], [1], [0, 0, 1, 1], [], []>} : vector<8x128xbf16>, vector<128x384xbf16>, vector<8x384xf32> -> vector<8x384xf32>
    %106 = vector.broadcast %8 : vector<1x384xf32> to vector<8x384xf32>
    %107 = arith.addf %105, %106 : vector<8x384xf32>
    %108 = vector.extract_strided_slice %103 {offsets = [0, 0], sizes = [8, 256], strides = [1, 1]} : vector<8x384xf32> to vector<8x256xf32>
    %109 = vector.extract_strided_slice %107 {offsets = [0, 0], sizes = [8, 256], strides = [1, 1]} : vector<8x384xf32> to vector<8x256xf32>
    %110 = arith.addf %108, %109 : vector<8x256xf32>
    %cst_31 = arith.constant 5.000000e-01 : f32
    %111 = vector.broadcast %cst_31 : f32 to vector<8x256xf32>
    %112 = arith.mulf %111, %110 : vector<8x256xf32>
    %113 = math.tanh %112 : vector<8x256xf32>
    %cst_32 = arith.constant 1.000000e+00 : f32
    %114 = vector.broadcast %cst_32 : f32 to vector<8x256xf32>
    %115 = arith.addf %113, %114 : vector<8x256xf32>
    %cst_33 = arith.constant 5.000000e-01 : f32
    %116 = vector.broadcast %cst_33 : f32 to vector<8x256xf32>
    %117 = arith.mulf %116, %115 : vector<8x256xf32>
    %118 = vector.extract_strided_slice %117 {offsets = [0, 0], sizes = [8, 128], strides = [1, 1]} : vector<8x256xf32> to vector<8x128xf32>
    %119 = vector.extract_strided_slice %117 {offsets = [0, 128], sizes = [8, 128], strides = [1, 1]} : vector<8x256xf32> to vector<8x128xf32>
    %120 = vector.extract_strided_slice %103 {offsets = [0, 256], sizes = [8, 128], strides = [1, 1]} : vector<8x384xf32> to vector<8x128xf32>
    %121 = vector.extract_strided_slice %107 {offsets = [0, 256], sizes = [8, 128], strides = [1, 1]} : vector<8x384xf32> to vector<8x128xf32>
    %122 = arith.mulf %118, %121 : vector<8x128xf32>
    %123 = arith.addf %120, %122 : vector<8x128xf32>
    %124 = math.tanh %123 : vector<8x128xf32>
    %cst_34 = arith.constant 1.000000e+00 : f32
    %125 = vector.broadcast %cst_34 : f32 to vector<8x128xf32>
    %126 = arith.subf %125, %119 : vector<8x128xf32>
    %127 = arith.mulf %126, %124 : vector<8x128xf32>
    %128 = arith.mulf %119, %99 : vector<8x128xf32>
    %129 = arith.addf %127, %128 : vector<8x128xf32>
    %130 = vector.extract_strided_slice %4 {offsets = [0, 8], sizes = [8, 2], strides = [1, 1]} : vector<8x16xbf16> to vector<8x2xbf16>
    %cst_35 = arith.constant dense<0.000000e+00> : vector<8x384xf32>
    %131 = tpu.matmul %130, %5, %cst_35 {dimension_numbers = #tpu.dot_dimension_numbers<[1], [0], [0], [1], [0, 0, 1, 1], [], []>} : vector<8x2xbf16>, vector<2x384xbf16>, vector<8x384xf32> -> vector<8x384xf32>
    %132 = vector.broadcast %7 : vector<1x384xf32> to vector<8x384xf32>
    %133 = arith.addf %131, %132 : vector<8x384xf32>
    %134 = arith.truncf %129 : vector<8x128xf32> to vector<8x128xbf16>
    %cst_36 = arith.constant dense<0.000000e+00> : vector<8x384xf32>
    %135 = tpu.matmul %134, %6, %cst_36 {dimension_numbers = #tpu.dot_dimension_numbers<[1], [0], [0], [1], [0, 0, 1, 1], [], []>} : vector<8x128xbf16>, vector<128x384xbf16>, vector<8x384xf32> -> vector<8x384xf32>
    %136 = vector.broadcast %8 : vector<1x384xf32> to vector<8x384xf32>
    %137 = arith.addf %135, %136 : vector<8x384xf32>
    %138 = vector.extract_strided_slice %133 {offsets = [0, 0], sizes = [8, 256], strides = [1, 1]} : vector<8x384xf32> to vector<8x256xf32>
    %139 = vector.extract_strided_slice %137 {offsets = [0, 0], sizes = [8, 256], strides = [1, 1]} : vector<8x384xf32> to vector<8x256xf32>
    %140 = arith.addf %138, %139 : vector<8x256xf32>
    %cst_37 = arith.constant 5.000000e-01 : f32
    %141 = vector.broadcast %cst_37 : f32 to vector<8x256xf32>
    %142 = arith.mulf %141, %140 : vector<8x256xf32>
    %143 = math.tanh %142 : vector<8x256xf32>
    %cst_38 = arith.constant 1.000000e+00 : f32
    %144 = vector.broadcast %cst_38 : f32 to vector<8x256xf32>
    %145 = arith.addf %143, %144 : vector<8x256xf32>
    %cst_39 = arith.constant 5.000000e-01 : f32
    %146 = vector.broadcast %cst_39 : f32 to vector<8x256xf32>
    %147 = arith.mulf %146, %145 : vector<8x256xf32>
    %148 = vector.extract_strided_slice %147 {offsets = [0, 0], sizes = [8, 128], strides = [1, 1]} : vector<8x256xf32> to vector<8x128xf32>
    %149 = vector.extract_strided_slice %147 {offsets = [0, 128], sizes = [8, 128], strides = [1, 1]} : vector<8x256xf32> to vector<8x128xf32>
    %150 = vector.extract_strided_slice %133 {offsets = [0, 256], sizes = [8, 128], strides = [1, 1]} : vector<8x384xf32> to vector<8x128xf32>
    %151 = vector.extract_strided_slice %137 {offsets = [0, 256], sizes = [8, 128], strides = [1, 1]} : vector<8x384xf32> to vector<8x128xf32>
    %152 = arith.mulf %148, %151 : vector<8x128xf32>
    %153 = arith.addf %150, %152 : vector<8x128xf32>
    %154 = math.tanh %153 : vector<8x128xf32>
    %cst_40 = arith.constant 1.000000e+00 : f32
    %155 = vector.broadcast %cst_40 : f32 to vector<8x128xf32>
    %156 = arith.subf %155, %149 : vector<8x128xf32>
    %157 = arith.mulf %156, %154 : vector<8x128xf32>
    %158 = arith.mulf %149, %129 : vector<8x128xf32>
    %159 = arith.addf %157, %158 : vector<8x128xf32>
    %160 = vector.extract_strided_slice %4 {offsets = [0, 10], sizes = [8, 2], strides = [1, 1]} : vector<8x16xbf16> to vector<8x2xbf16>
    %cst_41 = arith.constant dense<0.000000e+00> : vector<8x384xf32>
    %161 = tpu.matmul %160, %5, %cst_41 {dimension_numbers = #tpu.dot_dimension_numbers<[1], [0], [0], [1], [0, 0, 1, 1], [], []>} : vector<8x2xbf16>, vector<2x384xbf16>, vector<8x384xf32> -> vector<8x384xf32>
    %162 = vector.broadcast %7 : vector<1x384xf32> to vector<8x384xf32>
    %163 = arith.addf %161, %162 : vector<8x384xf32>
    %164 = arith.truncf %159 : vector<8x128xf32> to vector<8x128xbf16>
    %cst_42 = arith.constant dense<0.000000e+00> : vector<8x384xf32>
    %165 = tpu.matmul %164, %6, %cst_42 {dimension_numbers = #tpu.dot_dimension_numbers<[1], [0], [0], [1], [0, 0, 1, 1], [], []>} : vector<8x128xbf16>, vector<128x384xbf16>, vector<8x384xf32> -> vector<8x384xf32>
    %166 = vector.broadcast %8 : vector<1x384xf32> to vector<8x384xf32>
    %167 = arith.addf %165, %166 : vector<8x384xf32>
    %168 = vector.extract_strided_slice %163 {offsets = [0, 0], sizes = [8, 256], strides = [1, 1]} : vector<8x384xf32> to vector<8x256xf32>
    %169 = vector.extract_strided_slice %167 {offsets = [0, 0], sizes = [8, 256], strides = [1, 1]} : vector<8x384xf32> to vector<8x256xf32>
    %170 = arith.addf %168, %169 : vector<8x256xf32>
    %cst_43 = arith.constant 5.000000e-01 : f32
    %171 = vector.broadcast %cst_43 : f32 to vector<8x256xf32>
    %172 = arith.mulf %171, %170 : vector<8x256xf32>
    %173 = math.tanh %172 : vector<8x256xf32>
    %cst_44 = arith.constant 1.000000e+00 : f32
    %174 = vector.broadcast %cst_44 : f32 to vector<8x256xf32>
    %175 = arith.addf %173, %174 : vector<8x256xf32>
    %cst_45 = arith.constant 5.000000e-01 : f32
    %176 = vector.broadcast %cst_45 : f32 to vector<8x256xf32>
    %177 = arith.mulf %176, %175 : vector<8x256xf32>
    %178 = vector.extract_strided_slice %177 {offsets = [0, 0], sizes = [8, 128], strides = [1, 1]} : vector<8x256xf32> to vector<8x128xf32>
    %179 = vector.extract_strided_slice %177 {offsets = [0, 128], sizes = [8, 128], strides = [1, 1]} : vector<8x256xf32> to vector<8x128xf32>
    %180 = vector.extract_strided_slice %163 {offsets = [0, 256], sizes = [8, 128], strides = [1, 1]} : vector<8x384xf32> to vector<8x128xf32>
    %181 = vector.extract_strided_slice %167 {offsets = [0, 256], sizes = [8, 128], strides = [1, 1]} : vector<8x384xf32> to vector<8x128xf32>
    %182 = arith.mulf %178, %181 : vector<8x128xf32>
    %183 = arith.addf %180, %182 : vector<8x128xf32>
    %184 = math.tanh %183 : vector<8x128xf32>
    %cst_46 = arith.constant 1.000000e+00 : f32
    %185 = vector.broadcast %cst_46 : f32 to vector<8x128xf32>
    %186 = arith.subf %185, %179 : vector<8x128xf32>
    %187 = arith.mulf %186, %184 : vector<8x128xf32>
    %188 = arith.mulf %179, %159 : vector<8x128xf32>
    %189 = arith.addf %187, %188 : vector<8x128xf32>
    %190 = vector.extract_strided_slice %4 {offsets = [0, 12], sizes = [8, 2], strides = [1, 1]} : vector<8x16xbf16> to vector<8x2xbf16>
    %cst_47 = arith.constant dense<0.000000e+00> : vector<8x384xf32>
    %191 = tpu.matmul %190, %5, %cst_47 {dimension_numbers = #tpu.dot_dimension_numbers<[1], [0], [0], [1], [0, 0, 1, 1], [], []>} : vector<8x2xbf16>, vector<2x384xbf16>, vector<8x384xf32> -> vector<8x384xf32>
    %192 = vector.broadcast %7 : vector<1x384xf32> to vector<8x384xf32>
    %193 = arith.addf %191, %192 : vector<8x384xf32>
    %194 = arith.truncf %189 : vector<8x128xf32> to vector<8x128xbf16>
    %cst_48 = arith.constant dense<0.000000e+00> : vector<8x384xf32>
    %195 = tpu.matmul %194, %6, %cst_48 {dimension_numbers = #tpu.dot_dimension_numbers<[1], [0], [0], [1], [0, 0, 1, 1], [], []>} : vector<8x128xbf16>, vector<128x384xbf16>, vector<8x384xf32> -> vector<8x384xf32>
    %196 = vector.broadcast %8 : vector<1x384xf32> to vector<8x384xf32>
    %197 = arith.addf %195, %196 : vector<8x384xf32>
    %198 = vector.extract_strided_slice %193 {offsets = [0, 0], sizes = [8, 256], strides = [1, 1]} : vector<8x384xf32> to vector<8x256xf32>
    %199 = vector.extract_strided_slice %197 {offsets = [0, 0], sizes = [8, 256], strides = [1, 1]} : vector<8x384xf32> to vector<8x256xf32>
    %200 = arith.addf %198, %199 : vector<8x256xf32>
    %cst_49 = arith.constant 5.000000e-01 : f32
    %201 = vector.broadcast %cst_49 : f32 to vector<8x256xf32>
    %202 = arith.mulf %201, %200 : vector<8x256xf32>
    %203 = math.tanh %202 : vector<8x256xf32>
    %cst_50 = arith.constant 1.000000e+00 : f32
    %204 = vector.broadcast %cst_50 : f32 to vector<8x256xf32>
    %205 = arith.addf %203, %204 : vector<8x256xf32>
    %cst_51 = arith.constant 5.000000e-01 : f32
    %206 = vector.broadcast %cst_51 : f32 to vector<8x256xf32>
    %207 = arith.mulf %206, %205 : vector<8x256xf32>
    %208 = vector.extract_strided_slice %207 {offsets = [0, 0], sizes = [8, 128], strides = [1, 1]} : vector<8x256xf32> to vector<8x128xf32>
    %209 = vector.extract_strided_slice %207 {offsets = [0, 128], sizes = [8, 128], strides = [1, 1]} : vector<8x256xf32> to vector<8x128xf32>
    %210 = vector.extract_strided_slice %193 {offsets = [0, 256], sizes = [8, 128], strides = [1, 1]} : vector<8x384xf32> to vector<8x128xf32>
    %211 = vector.extract_strided_slice %197 {offsets = [0, 256], sizes = [8, 128], strides = [1, 1]} : vector<8x384xf32> to vector<8x128xf32>
    %212 = arith.mulf %208, %211 : vector<8x128xf32>
    %213 = arith.addf %210, %212 : vector<8x128xf32>
    %214 = math.tanh %213 : vector<8x128xf32>
    %cst_52 = arith.constant 1.000000e+00 : f32
    %215 = vector.broadcast %cst_52 : f32 to vector<8x128xf32>
    %216 = arith.subf %215, %209 : vector<8x128xf32>
    %217 = arith.mulf %216, %214 : vector<8x128xf32>
    %218 = arith.mulf %209, %189 : vector<8x128xf32>
    %219 = arith.addf %217, %218 : vector<8x128xf32>
    %220 = vector.extract_strided_slice %4 {offsets = [0, 14], sizes = [8, 2], strides = [1, 1]} : vector<8x16xbf16> to vector<8x2xbf16>
    %cst_53 = arith.constant dense<0.000000e+00> : vector<8x384xf32>
    %221 = tpu.matmul %220, %5, %cst_53 {dimension_numbers = #tpu.dot_dimension_numbers<[1], [0], [0], [1], [0, 0, 1, 1], [], []>} : vector<8x2xbf16>, vector<2x384xbf16>, vector<8x384xf32> -> vector<8x384xf32>
    %222 = vector.broadcast %7 : vector<1x384xf32> to vector<8x384xf32>
    %223 = arith.addf %221, %222 : vector<8x384xf32>
    %224 = arith.truncf %219 : vector<8x128xf32> to vector<8x128xbf16>
    %cst_54 = arith.constant dense<0.000000e+00> : vector<8x384xf32>
    %225 = tpu.matmul %224, %6, %cst_54 {dimension_numbers = #tpu.dot_dimension_numbers<[1], [0], [0], [1], [0, 0, 1, 1], [], []>} : vector<8x128xbf16>, vector<128x384xbf16>, vector<8x384xf32> -> vector<8x384xf32>
    %226 = vector.broadcast %8 : vector<1x384xf32> to vector<8x384xf32>
    %227 = arith.addf %225, %226 : vector<8x384xf32>
    %228 = vector.extract_strided_slice %223 {offsets = [0, 0], sizes = [8, 256], strides = [1, 1]} : vector<8x384xf32> to vector<8x256xf32>
    %229 = vector.extract_strided_slice %227 {offsets = [0, 0], sizes = [8, 256], strides = [1, 1]} : vector<8x384xf32> to vector<8x256xf32>
    %230 = arith.addf %228, %229 : vector<8x256xf32>
    %cst_55 = arith.constant 5.000000e-01 : f32
    %231 = vector.broadcast %cst_55 : f32 to vector<8x256xf32>
    %232 = arith.mulf %231, %230 : vector<8x256xf32>
    %233 = math.tanh %232 : vector<8x256xf32>
    %cst_56 = arith.constant 1.000000e+00 : f32
    %234 = vector.broadcast %cst_56 : f32 to vector<8x256xf32>
    %235 = arith.addf %233, %234 : vector<8x256xf32>
    %cst_57 = arith.constant 5.000000e-01 : f32
    %236 = vector.broadcast %cst_57 : f32 to vector<8x256xf32>
    %237 = arith.mulf %236, %235 : vector<8x256xf32>
    %238 = vector.extract_strided_slice %237 {offsets = [0, 0], sizes = [8, 128], strides = [1, 1]} : vector<8x256xf32> to vector<8x128xf32>
    %239 = vector.extract_strided_slice %237 {offsets = [0, 128], sizes = [8, 128], strides = [1, 1]} : vector<8x256xf32> to vector<8x128xf32>
    %240 = vector.extract_strided_slice %223 {offsets = [0, 256], sizes = [8, 128], strides = [1, 1]} : vector<8x384xf32> to vector<8x128xf32>
    %241 = vector.extract_strided_slice %227 {offsets = [0, 256], sizes = [8, 128], strides = [1, 1]} : vector<8x384xf32> to vector<8x128xf32>
    %242 = arith.mulf %238, %241 : vector<8x128xf32>
    %243 = arith.addf %240, %242 : vector<8x128xf32>
    %244 = math.tanh %243 : vector<8x128xf32>
    %cst_58 = arith.constant 1.000000e+00 : f32
    %245 = vector.broadcast %cst_58 : f32 to vector<8x128xf32>
    %246 = arith.subf %245, %239 : vector<8x128xf32>
    %247 = arith.mulf %246, %244 : vector<8x128xf32>
    %248 = arith.mulf %239, %219 : vector<8x128xf32>
    %249 = arith.addf %247, %248 : vector<8x128xf32>
    %c0_59 = arith.constant 0 : index
    %c0_60 = arith.constant 0 : index
    %250 = vector.load %arg13[%c0_59, %c0_60] : memref<4x128xf32, #tpu.memory_space<vmem>>, vector<4x128xf32>
    %c0_61 = arith.constant 0 : index
    %c0_62 = arith.constant 0 : index
    %251 = vector.load %arg7[%c0_61, %c0_62] : memref<4x8xbf16, #tpu.memory_space<vmem>>, vector<4x8xbf16>
    %252 = arith.truncf %249 : vector<8x128xf32> to vector<8x128xbf16>
    %cst_63 = arith.constant dense<0.000000e+00> : vector<4x128xf32>
    %253 = tpu.matmul %251, %252, %cst_63 {dimension_numbers = #tpu.dot_dimension_numbers<[1], [0], [0], [1], [0, 0, 1, 1], [], []>} : vector<4x8xbf16>, vector<8x128xbf16>, vector<4x128xf32> -> vector<4x128xf32>
    %254 = arith.addf %250, %253 : vector<4x128xf32>
    %c0_64 = arith.constant 0 : index
    %c0_65 = arith.constant 0 : index
    %255 = vector.load %arg13[%c0_64, %c0_65] : memref<4x128xf32, #tpu.memory_space<vmem>>, vector<4x128xf32>
    tpu.vector_store %arg13[%c0_64, %c0_65], %254 {strides = array<i32>} : memref<4x128xf32, #tpu.memory_space<vmem>>, vector<4x128xf32>,
    %c0_i32_66 = arith.constant 0 : i32
    %256 = arith.cmpi eq, %arg1, %c0_i32_66 : i32
    %257 = arith.extui %256 : i1 to i32
    %c0_i32_67 = arith.constant 0 : i32
    %258 = arith.cmpi ne, %257, %c0_i32_67 : i32
    scf.if %258 {
      %c0_68 = arith.constant 0 : index
      %c0_69 = arith.constant 0 : index
      %259 = vector.load %arg13[%c0_68, %c0_69] : memref<4x128xf32, #tpu.memory_space<vmem>>, vector<4x128xf32>
      %260 = arith.truncf %259 : vector<4x128xf32> to vector<4x128xbf16>
      %c0_70 = arith.constant 0 : index
      %c0_71 = arith.constant 0 : index
      %261 = vector.load %arg8[%c0_70, %c0_71] : memref<128x128xbf16, #tpu.memory_space<vmem>>, vector<128x128xbf16>
      %cst_72 = arith.constant dense<0.000000e+00> : vector<4x128xf32>
      %262 = tpu.matmul %260, %261, %cst_72 {dimension_numbers = #tpu.dot_dimension_numbers<[1], [0], [0], [1], [0, 0, 1, 1], [], []>} : vector<4x128xbf16>, vector<128x128xbf16>, vector<4x128xf32> -> vector<4x128xf32>
      %c0_73 = arith.constant 0 : index
      %c0_74 = arith.constant 0 : index
      %263 = vector.load %arg9[%c0_73, %c0_74] : memref<1x128xf32, #tpu.memory_space<vmem>>, vector<1x128xf32>
      %264 = vector.broadcast %263 : vector<1x128xf32> to vector<4x128xf32>
      %265 = arith.addf %262, %264 : vector<4x128xf32>
      %266 = math.tanh %265 : vector<4x128xf32>
      %267 = arith.truncf %266 : vector<4x128xf32> to vector<4x128xbf16>
      %c0_75 = arith.constant 0 : index
      %c0_76 = arith.constant 0 : index
      %268 = vector.load %arg10[%c0_75, %c0_76] : memref<128x128xbf16, #tpu.memory_space<vmem>>, vector<128x128xbf16>
      %cst_77 = arith.constant dense<0.000000e+00> : vector<4x128xf32>
      %269 = tpu.matmul %267, %268, %cst_77 {dimension_numbers = #tpu.dot_dimension_numbers<[1], [0], [0], [1], [0, 0, 1, 1], [], []>} : vector<4x128xbf16>, vector<128x128xbf16>, vector<4x128xf32> -> vector<4x128xf32>
      %c0_78 = arith.constant 0 : index
      %c0_79 = arith.constant 0 : index
      %270 = vector.load %arg11[%c0_78, %c0_79] : memref<1x128xf32, #tpu.memory_space<vmem>>, vector<1x128xf32>
      %271 = vector.broadcast %270 : vector<1x128xf32> to vector<4x128xf32>
      %272 = arith.addf %269, %271 : vector<4x128xf32>
      %c0_80 = arith.constant 0 : index
      %c0_81 = arith.constant 0 : index
      %c0_82 = arith.constant 0 : index
      %273 = vector.load %arg12[%c0_80, %c0_81, %c0_82] : memref<1x4x128xf32, #tpu.memory_space<vmem>>, vector<1x4x128xf32>
      %274 = vector.shape_cast %273 : vector<1x4x128xf32> to vector<4x128xf32>
      %275 = vector.shape_cast %272 : vector<4x128xf32> to vector<1x4x128xf32>
      tpu.vector_store %arg12[%c0_80, %c0_81, %c0_82], %275 {strides = array<i32>} : memref<1x4x128xf32, #tpu.memory_space<vmem>>, vector<1x4x128xf32>,
    } else {
    }
    return
  }
  func.func @transform_0(%arg0: i32, %arg1: i32) -> (i32, i32, i32) {
    %c0_i32 = arith.constant 0 : i32
    %c0_i32_0 = arith.constant 0 : i32
    return %arg0, %arg1, %c0_i32 : i32, i32, i32
  }
  func.func @transform_1(%arg0: i32, %arg1: i32) -> (i32, i32) {
    %c0_i32 = arith.constant 0 : i32
    %c0_i32_0 = arith.constant 0 : i32
    %c0_i32_1 = arith.constant 0 : i32
    return %c0_i32, %c0_i32_0 : i32, i32
  }
  func.func @transform_2(%arg0: i32, %arg1: i32) -> (i32, i32) {
    %c0_i32 = arith.constant 0 : i32
    %c0_i32_0 = arith.constant 0 : i32
    %c0_i32_1 = arith.constant 0 : i32
    return %c0_i32, %c0_i32_0 : i32, i32
  }
  func.func @transform_3(%arg0: i32, %arg1: i32) -> (i32, i32) {
    %c0_i32 = arith.constant 0 : i32
    %c0_i32_0 = arith.constant 0 : i32
    %c0_i32_1 = arith.constant 0 : i32
    return %c0_i32, %c0_i32_0 : i32, i32
  }
  func.func @transform_4(%arg0: i32, %arg1: i32) -> (i32, i32) {
    %c0_i32 = arith.constant 0 : i32
    %c0_i32_0 = arith.constant 0 : i32
    %c0_i32_1 = arith.constant 0 : i32
    return %c0_i32, %c0_i32_0 : i32, i32
  }
  func.func @transform_5(%arg0: i32, %arg1: i32) -> (i32, i32) {
    %c0_i32 = arith.constant 0 : i32
    %c0_i32_0 = arith.constant 0 : i32
    return %c0_i32, %arg1 : i32, i32
  }
  func.func @transform_6(%arg0: i32, %arg1: i32) -> (i32, i32) {
    %c0_i32 = arith.constant 0 : i32
    %c0_i32_0 = arith.constant 0 : i32
    %c0_i32_1 = arith.constant 0 : i32
    return %c0_i32, %c0_i32_0 : i32, i32
  }
  func.func @transform_7(%arg0: i32, %arg1: i32) -> (i32, i32) {
    %c0_i32 = arith.constant 0 : i32
    %c0_i32_0 = arith.constant 0 : i32
    %c0_i32_1 = arith.constant 0 : i32
    return %c0_i32, %c0_i32_0 : i32, i32
  }
  func.func @transform_8(%arg0: i32, %arg1: i32) -> (i32, i32) {
    %c0_i32 = arith.constant 0 : i32
    %c0_i32_0 = arith.constant 0 : i32
    %c0_i32_1 = arith.constant 0 : i32
    return %c0_i32, %c0_i32_0 : i32, i32
  }
  func.func @transform_9(%arg0: i32, %arg1: i32) -> (i32, i32) {
    %c0_i32 = arith.constant 0 : i32
    %c0_i32_0 = arith.constant 0 : i32
    %c0_i32_1 = arith.constant 0 : i32
    return %c0_i32, %c0_i32_0 : i32, i32
  }
  func.func @transform_10(%arg0: i32, %arg1: i32) -> (i32, i32, i32) {
    %c0_i32 = arith.constant 0 : i32
    %c0_i32_0 = arith.constant 0 : i32
    %c0_i32_1 = arith.constant 0 : i32
    return %arg0, %c0_i32, %c0_i32_0 : i32, i32, i32
  }
}

</mosaic_0001>

<bundles_post_ra>
// kernel: tpu_custom_call.1
= control target key start
LH: loop header
LB: loop body
LE: loop exit
PB: predicated region body
PF: predicated region fallthrough
CT: control target
= control target key end

     0   :  { %s4460_s0 = inlined_call_operand.hbm [shape: bf16[2,8,16], index: 0, kind: input, shape index: {}]   ;;  %s4461_s1 = inlined_call_operand.hbm [shape: bf16[2,384], index: 1, kind: input, shape index: {}]   ;;  %s4462_s2 = inlined_call_operand.vmem [shape: f32[1,384], index: 2, kind: input, shape index: {}]   ;;  %s4463_s3 = inlined_call_operand.hbm [shape: bf16[128,384], index: 3, kind: input, shape index: {}]   ;;  %s4464_s4 = inlined_call_operand.vmem [shape: f32[1,384], index: 4, kind: input, shape index: {}]   ;;  %s4465_s5 = inlined_call_operand.vmem [shape: bf16[4,8], index: 5, kind: input, shape index: {}]   ;;  %s4466_s6 = inlined_call_operand.hbm [shape: bf16[128,128], index: 6, kind: input, shape index: {}]   ;;  %s4467_s7 = inlined_call_operand.vmem [shape: f32[1,128], index: 7, kind: input, shape index: {}]   ;;  %s4468_s8 = inlined_call_operand.hbm [shape: bf16[128,128], index: 8, kind: input, shape index: {}]   ;;  %s4469_s9 = inlined_call_operand.vmem [shape: f32[1,128], index: 9, kind: input, shape index: {}]   ;;  %s4470_s10 = inlined_call_operand.hbm [shape: f32[2,4,128], index: 10, kind: output, shape index: {}]  }
   0x1   :  { %4474 = sst [smem:[#allocation20_spill]] %s4461_s1 }
   0x2   :  { %4475 = sst [smem:[#allocation21_spill]] %s4463_s3 }
   0x3   :  { %4476 = sst [smem:[#allocation22_spill]] %s4466_s6 }
   0x4   :  { %4477 = sst [smem:[#allocation23_spill]] %s4468_s8 }
   0x5   :  { %15 = vsyncpa [#allocation4], 0 }
   0x6   :  { %17 = vsyncpa [#allocation4 + $0x1], 0 }
   0x7   :  { %18 = vsyncpa [#allocation7], 0 }
   0x8   :  { %19 = vsyncpa [#allocation10], 0 }
   0x9   :  { %20 = vsyncpa [#allocation5], 0 }
   0xa   :  { %22 = vsyncpa [#allocation5 + $0x1], 0  ;;  %s3601_s13 = smov 0   ;;  %s3603_s14 = smov 0  }
   0xb   :  { %s3605_s15 = smov 0   ;;  %s3607_s16 = smov 0  }
   0xc   :  { %s3609_s17 = smov 0   ;;  %s3611_s18 = smov 0  }
   0xd LB: > { %4478 = sst [smem:[#allocation17_spill]] %s3519_s17  ;;  %s4471_s19 = sadd.s32 4294967295, %s3523_s18   ;;  %s3523_s18 = sphi %s3611_s18, %s28_s18   ;;  %s3519_s17 = sphi %s3609_s17, %s4498_s17   ;;  %s3515_s16 = sphi %s3607_s16, %s4497_s16   ;;  %s3511_s15 = sphi %s3605_s15, %s4501_s15   ;;  %s3507_s14 = sphi %s3603_s14, %s4500_s14   ;;  %s3503_s13 = sphi %s3601_s13, %s4499_s13  }
   0xe   : > { %p2611_p0 = scmp.ge.s32.totalorder %s3523_s18, 1  ;;  %p3635_p1 = scmp.eq.s32.totalorder %s4471_s19, 0 }
   0xf   : > { %p293_p2 = scmp.lt.s32.totalorder %s3523_s18, 3  ;;  %s3525_s22 = smov [#allocation6]  }
  0x10   : > { %s306_s23 = sshll.u32 %s3525_s22, 4  ;;  %s3526_s24 = smov [#allocation9]   ;;  %s307_s23 = int_to_ptr.vmem [resolvable:$true] %s306_s23 }
  0x11   : > { %p3640_p3 = pnand %p2611_p0, %p293_p2  ;;  %s342_s25 = sshll.u32 %s3526_s24, 4  ;;  %s3653_s25 = int_to_ptr.vmem [resolvable:$true] %s342_s25 }
  0x12   : > { %s3527_s27 = smov [#allocation8]   ;;  %s3314_s29 = scalar_lea.vmem %s307_s23, 48 }
  0x13   : > { %p3082_p5 = pneg %p3640_p3  ;;  %s319_s28 = sshll.u32 %s3527_s27, 4  ;;  %s320_s28 = int_to_ptr.vmem [resolvable:$true] %s319_s28 }
  0x14   : > { %p3315_p8 = scmp.ne.s32.totalorder %s307_s23, %s3314_s29  ;;  %s3321_s30 = scalar_lea.vmem %s307_s23, 64 }
  0x15   : > { %p3649_p6 = pnand %p3082_p5, %p3635_p1  ;;  %p3322_p11 = scmp.lt.s32.totalorder %s307_s23, %s307_s23 }
  0x16   : > { %p3323_p12 = scmp.lt.s32.totalorder %s3321_s30, %s3314_s29 }
  0x17   : > { %p3305_p7 = pneg %p3649_p6 }
  0x18   : > { %p3324_p13 = por %p3323_p12, %p3322_p11 }
  0x19   : > { %p3317_p9 = pnand %p3315_p8, %p3305_p7 }
  0x1b   : > { %p3318_p10 = pneg %p3317_p9 }
  0x1d   : > { %p3325_p0 = pnand %p3324_p13, %p3318_p10 }
  0x1f   : > { %3328 = shalt.err (!%p3325_p0)
}
  0x20   : > { %s4482_s1 = sld [smem:[#allocation20_spill]]  ;;  %s3340_s22 = scalar_lea.vmem %s3653_s25, 1024 }
  0x21   : > { %p3341_p2 = scmp.ne.s32.totalorder %s3653_s25, %s3340_s22  ;;  %p3348_p9 = scmp.lt.s32.totalorder %s3653_s25, %s3653_s25 }
  0x22   : > { %p3349_p10 = scmp.lt.s32.totalorder %s3340_s22, %s3340_s22 }
  0x23   : > { %p3343_p5 = pnand %p3341_p2, %p3305_p7 }
  0x24   : > { %p3350_p11 = por %p3349_p10, %p3348_p9 }
  0x25   : > { %p3344_p8 = pneg %p3343_p5 }
  0x26   : > { %3085 = dma.hbm_to_vmem [thread:$0]  (!%p3649_p6), %s4482_s1, 48, %s307_s23, [#allocation7]  }
  0x27   : > { %p3351_p12 = pnand %p3350_p11, %p3344_p8 }
  0x29   : > { %3354 = shalt.err (!%p3351_p12)
}
  0x2a   : > { %s3528_s24 = smov 64   ;;  %s3529_s27 = smov 4  }
  0x2b   : > { %s4483_s6 = sld [smem:[#allocation22_spill]]  ;;  %s3366_s30 = scalar_lea.vmem %s320_s28, 3072 }
  0x2c   : > { %p3367_p13 = scmp.ne.s32.totalorder %s320_s28, %s3366_s30  ;;  %p3374_p5 = scmp.lt.s32.totalorder %s320_s28, %s320_s28 }
  0x2d   : > { %p3375_p8 = scmp.lt.s32.totalorder %s3366_s30, %s3366_s30 }
  0x2e   : > { %p3369_p0 = pnand %p3367_p13, %p3305_p7 }
  0x2f   : > { %p3376_p9 = por %p3375_p8, %p3374_p5 }
  0x30   : > { %p3370_p2 = pneg %p3369_p0 }
  0x31   : > { %3091 = dma.hbm_to_vmem [thread:$0]  (!%p3649_p6), %s4483_s6, 1024, %s3653_s25, [#allocation10], %s3528_s24, %s3528_s24, %s3529_s27  }
  0x32   : > { %p3377_p10 = pnand %p3376_p9, %p3370_p2 }
  0x34   : > { %3380 = shalt.err (!%p3377_p10)
}
  0x35   : > { %s3530_s11 = smov 192   ;;  %s3531_s12 = smov 12  }
  0x36   : > { %s4484_s3 = sld [smem:[#allocation21_spill]]  ;;  %s3532_s25 = smov [#allocation11]  }
  0x37   : > { %s358_s29 = sshll.u32 %s3532_s25, 4  ;;  %s359_s29 = int_to_ptr.vmem [resolvable:$true] %s358_s29 }
  0x38   : > { %s3392_s19 = scalar_lea.vmem %s359_s29, 1024  ;;  %p3400_p0 = scmp.lt.s32.totalorder %s359_s29, %s359_s29 }
  0x39   : > { %p3393_p11 = scmp.ne.s32.totalorder %s359_s29, %s3392_s19  ;;  %p3401_p2 = scmp.lt.s32.totalorder %s3392_s19, %s3392_s19 }
  0x3b   : > { %p3395_p12 = pnand %p3393_p11, %p3305_p7  ;;  %p3402_p5 = por %p3401_p2, %p3400_p0 }
  0x3c   : > { %3088 = dma.hbm_to_vmem [thread:$0]  (!%p3649_p6), %s4484_s3, 3072, %s320_s28, [#allocation7], %s3530_s11, %s3530_s11, %s3531_s12  }
  0x3d   : > { %p3396_p13 = pneg %p3395_p12 }
  0x3f   : > { %p3403_p8 = pnand %p3402_p5, %p3396_p13 }
  0x41   : > { %3406 = shalt.err (!%p3403_p8)
}
  0x42   : > { %s4485_s8 = sld [smem:[#allocation23_spill]]  ;;  %s2610_s19 = sadd.s32 4294967294, %s3523_s18  }
  0x43   : > { %s40_s26 = sadd.s32 1, %s3519_s17  ;;  %s49_s11 = sadd.s32 1, %s3511_s15 }
  0x44   : > { %p42_p7 = scmp.ge.s32.totalorder %s40_s26, 2  ;;  %p56_p9 = scmp.ne.s32.totalorder %s3511_s15, %s3507_s14 }
  0x45   : > { %p57_p10 = scmp.eq.s32.totalorder %s3523_s18, 0  ;;  %p62_p12 = scmp.ne.s32.totalorder %s3507_s14, %s3503_s13 }
  0x46   : > { %s4503_s26 = smov (%p42_p7, %s40_s26), 0  ;;  %p286_p5 = scmp.eq.s32.totalorder %s2610_s19, 1 }
  0x47   : > { %4486 = sst [smem:[#allocation18_spill]] %s4503_s26  ;;  %p3708_p11 = por %p57_p10, %p56_p9 }
  0x48   : > { %3094 = dma.hbm_to_vmem [thread:$0]  (!%p3649_p6), %s4485_s8, 1024, %s359_s29, [#allocation10], %s3528_s24, %s3528_s24, %s3529_s27  }
  0x49   : > { %s44_s24 = ssub.s32 %s3519_s17, %s4503_s26  ;;  %s4488_s27 = sadd.s32 4294967295, %s3523_s18  }
  0x4a   : > { %p280_p6 = scmp.eq.s32.totalorder %s4488_s27, 1  ;;  %p47_p13 = scmp.eq.s32.totalorder %s44_s24, 0 }
  0x4b   : > { %p3720_p0 = por %p3635_p1, %p62_p12  ;;  %p3731_p8 = por %p286_p5, %p62_p12 }
  0x4c   : > { %p3724_p2 = por %p280_p6, %p56_p9  ;;  %p3107_p7 = scmp.lt.s32.totalorder %s3523_s18, 2 }
  0x4d   : > { %s3729_s25 = scalar_select %p47_p13, %s3511_s15, %s49_s11  }
  0x4e   : > { %s4492_s29 = scalar_select %p3731_p8, 1, 0 }
  0x4f   : > { %4491 = sst [smem:[#allocation19_spill]] %s3729_s25  ;;  %s375_s28 = sand.u32 1, %s3511_s15  }
  0x50   : > { %s2619_s30 = sshll.u32 %s3519_s17, 6  ;;  %s2618_s24 = sshll.u32 %s375_s28, 2 }
  0x51   : > { %s385_s3 = scalar_lea.hbm %s4460_s0, %s2619_s30  ;;  %s379_s6 = scalar_lea.vmem [#allocation3], %s2618_s24 }
  0x52   : > { %s387_s8 = sshll.u32 %s379_s6, 4  ;;  %p3743_p9 = pnand %p3107_p7, %p3708_p11  ;;  %s388_s8 = int_to_ptr.vmem [resolvable:$true] %s387_s8 }
  0x53   : > { %s376_s19 = scalar_lea.sflag [#allocation4], %s375_s28  ;;  %s3420_s11 = scalar_lea.vmem %s388_s8, 64 }
  0x54   : > { %p3409_p10 = pneg %p3743_p9  ;;  %p3421_p12 = scmp.ne.s32.totalorder %s388_s8, %s3420_s11 }
  0x55   : > { %s3533_s17 = smov [#allocation3]  }
  0x56   : > { %p3423_p6 = pnand %p3421_p12, %p3409_p10  ;;  %s3425_s25 = sshll.u32 %s3533_s17, 4  ;;  %s3426_s25 = int_to_ptr.vmem [resolvable:$false] %s3425_s25 }
  0x57   : > { %s3427_s1 = scalar_lea.vmem %s3426_s25, 128  ;;  %p3428_p5 = scmp.lt.s32.totalorder %s388_s8, %s3426_s25 }
  0x58   : > { %p3424_p13 = pneg %p3423_p6  ;;  %p3429_p4 = scmp.lt.s32.totalorder %s3427_s1, %s3420_s11 }
  0x5a   : > { %p3430_p8 = por %p3429_p4, %p3428_p5 }
  0x5c   : > { %p3431_p11 = pnand %p3430_p8, %p3424_p13 }
  0x5e   : > { %3434 = shalt.err (!%p3431_p11)
}
  0x5f   : > { %3098 = dma.hbm_to_vmem [thread:$0]  (!%p3743_p9), %s385_s3, 64, %s388_s8, %s376_s19  }
  0x60   : > { %396 = sbr.rel (%p3640_p3) target bundleno = 2708 (0xa94), region = 60  ;;  %s3754_s6 = sand.u32 (!%p3640_p3), 1, %s3507_s14  }
  0x61   : > { %s2621_s17 = sshll.u32 (!%p3640_p3), %s3754_s6, 2  ;;  %s399_s12 = scalar_lea.sflag (!%p3640_p3), [#allocation4], %s3754_s6 }
  0x62   : > { %s402_s25 = scalar_lea.vmem (!%p3640_p3), [#allocation3], %s2621_s17 }
  0x65   : > { %3486 = dma.done.wait (%p3720_p0), %s399_s12, 64  }
  0x66   : > { %3488 = vsyncadd (%p3720_p0), %s399_s12, 4294967232 }
  0x67   : > { %3490 = dma.done.wait (%p3635_p1), [#allocation7], 3120  }
  0x68   : > { %3492 = vsyncadd (%p3635_p1), [#allocation7], 4294964176 }
  0x69   : > { %3494 = dma.done.wait (%p3635_p1), [#allocation10], 2048  }
  0x6a   : > { %3496 = vsyncadd (%p3635_p1), [#allocation10], 4294965248  ;;  %v506_v0 = vlaneseq  ;;  %v3534_v1 = vmov 1966171168   ;;  %v3535_v3 = vmov 0   ;;  %v3536_v5 = vmov 0.0  }
  0x6b   : > { %v531_v2 = vunpack.c.l.s4 %v3534_v1  ;;  %591 = vmatprep.mubr.bf16.mxu0 %v3535_v3  ;;  %2808 = vmatprep.subr.bf16.mxu1 %v3536_v5  ;;  %468 = vst [vmem:[#allocation2] sm:$0xf] %v3536_v5  ;;  %vm3537_vm0 = vmmov 0   ;;  %vm549_vm1 = vcmask 1040384   ;;  %v469_v9 = vld [vmem:[%s402_s25] sm:$0xf] }
  0x6c   : > { %v3773_v4 = vshrl.u32 %v506_v0, 7  ;;  %2810 = vmatprep.mubr.msk.bf16.mxu1 %vm3537_vm0, %v3536_v5  ;;  %v2627_v8 = vld.sshfl [vmem:[#allocation6] sm:$0x13 pattern:$0x75316420]  ;;  %v3780_v12 = vcombine.low %v469_v9, %v469_v9  ;;  %s3538_s3 = smov 126  }
  0x6d   : > { %v532_v6 = vunpack.c.0.s8 %v531_v2  ;;  %v529_v10 = vcombine.high %v2627_v8, %v2627_v8  ;;  %v3787_v15 = vld [vmem:[#allocation8 + $0xac] ss:$12 sps:$4 sm:$0xff]   ;;  %vm545_vm2 = vcmask 15360   ;;  %v3796_v18 = vld [vmem:[#allocation8 + $0xa8] ss:$12 sps:$4 sm:$0xff]   ;;  %s3539_s8 = smov 124  }
  0x6e   : > { %885 = vrot.lane.b32.xlu0 %v3780_v12, %s3538_s3  ;;  %v3800_v19 = vld [vmem:[#allocation8 + $0x94] ss:$12 sps:$4 sm:$0xff]   ;;  %v3803_v20 = vld [vmem:[#allocation8 + $0xb0] ss:$12 sps:$4 sm:$0xff]   ;;  %v3811_v22 = vld [vmem:[#allocation8 + $0x98] ss:$12 sps:$4 sm:$0xff]  }
  0x6f   : > { %v535_v7 = vsub.s32 %v532_v6, %v3773_v4  ;;  %v3806_v21 = vld [vmem:[#allocation8 + $0x90] ss:$12 sps:$4 sm:$0xff]   ;;  %v3821_v24 = vld [vmem:[#allocation8 + $0x78] ss:$12 sps:$4 sm:$0xff]   ;;  %v3824_v25 = vld [vmem:[#allocation8 + $0x80] ss:$12 sps:$4 sm:$0xff]  }
  0x70   : > { %v3814_v23 = vld [vmem:[#allocation8 + $0x7c] ss:$12 sps:$4 sm:$0xff]   ;;  %v3827_v26 = vld [vmem:[#allocation8 + $0x64] ss:$12 sps:$4 sm:$0xff]   ;;  %v3830_v27 = vld [vmem:[#allocation8 + $0x60] ss:$12 sps:$4 sm:$0xff]  }
  0x71   : > { %v536_v11 = vrot.slane %v2627_v8, %v535_v7  ;;  %v3782_v13 = vrot.slane %v529_v10, %v535_v7  ;;  %v3834_v28 = vld [vmem:[#allocation8 + $0x68] ss:$12 sps:$4 sm:$0xff]   ;;  %v3837_v29 = vld [vmem:[#allocation8 + $0x4c] ss:$12 sps:$4 sm:$0xff]   ;;  %v3842_v31 = vld [vmem:[#allocation8 + $0x50] ss:$12 sps:$4 sm:$0xff]  }
  0x72   : > { %v3840_v30 = vld [vmem:[#allocation8 + $0x48] ss:$12 sps:$4 sm:$0xff]   ;;  %v3850_v33 = vld [vmem:[#allocation8 + $0x30] ss:$12 sps:$4 sm:$0xff]   ;;  %v3852_v34 = vld [vmem:[#allocation8 + $0x38] ss:$12 sps:$4 sm:$0xff]   ;;  %1070 = vrot.lane.b32.xlu0 %v3780_v12, %s3539_s8 }
  0x73   : > { %v3785_v14 = vsel %vm549_vm1, %v536_v11, 0  ;;  %v544_v16 = vcombine.high %v536_v11, %v536_v11  ;;  %2628 = vmatprep.subr.msk.bf16.mxu0 %vm549_vm1, %v3782_v13  ;;  %v3844_v32 = vld [vmem:[#allocation8 + $0x34] ss:$12 sps:$4 sm:$0xff]   ;;  %v3854_v35 = vld [vmem:[#allocation8 + $0x1c] ss:$12 sps:$4 sm:$0xff]   ;;  %v508_v50 = vsub.s32 0, %v3773_v4 }
  0x74   : > { %574 = vmatpush1.bf16.msra.mxu0 %v3785_v14  ;;  %v3860_v36 = vld [vmem:[#allocation8 + $0x18] ss:$12 sps:$4 sm:$0xff]   ;;  %v3864_v37 = vld [vmem:[#allocation8 + $0x20] ss:$12 sps:$4 sm:$0xff]   ;;  %v3874_v40 = vld [vmem:[#allocation8 + $0x8] ss:$12 sps:$4 sm:$0xff]  }
  0x75   : > { %v3793_v17 = vsel %vm549_vm1, %v544_v16, 0  ;;  %784 = vmatprep.subr.bf16.mxu0 %v3787_v15  ;;  %v3867_v38 = vld [vmem:[#allocation8 + $0x4] ss:$12 sps:$4 sm:$0xff]   ;;  %v3871_v39 = vld [vmem:[#allocation8] ss:$12 sps:$4 sm:$0xff]   ;;  %v512_v55 = vsub.s32 1, %v3773_v4 }
  0x76   : > { %2809 = vmatpush3.bf16.msra.mxu1 %v3793_v17  ;;  %v503_v51 = vld [vmem:[%s4462_s2] sm:$0x7]  ;;  %s3540_s28 = smov 122   ;;  %s3541_s30 = smov 120   ;;  %vm2187_vm3 = vcmask 1043456   ;;  %vm2183_vm4 = vcmask 64512  }
  0x77   : > { %2814 = vmatprep.subr.bf16.mxu1 %v3536_v5  ;;  %2629 = vmatmul.mubr.msk.bf16.vlgmr.msra.gmra.mxu0 %vm545_vm2, %v469_v9  ;;  %v504_v52 = vld [vmem:[%s4464_s4] sm:$0x7]  ;;  %v3938_v53 = vrot.slane %v503_v51, %v508_v50  ;;  %v3947_v63 = vrot.slane %v503_v51, %v512_v55  ;;  %s3542_s24 = smov 118   ;;  %s3543_s27 = smov 116  }
  0x78   : > { %785 = vmatpush1.bf16.msra.mxu0 %v3796_v18  ;;  %816 = vmatprep.mubr.bf16.mxu0 %v3535_v3  ;;  %v3940_v54 = vrot.slane %v504_v52, %v508_v50  ;;  %v3945_v60 = vrot.slane %v504_v52, %v512_v55  ;;  %s3544_s19 = smov 114   ;;  %s2697_s20 = sshll.u32 %s3515_s16, 6 }
  0x79   : > { %2811 = vmatmul.mubr.msk.bf16.vlgmr.msra.gmra.mxu1 %vm545_vm2, %v469_v9  ;;  %786 = vmatprep.subr.bf16.mxu0 %v3800_v19  ;;  %s458_s21 = scalar_lea.vmem [#allocation12], %s2621_s17  ;;  %s3545_s17 = smov [#allocation12]  }
  0x7a   : > { %2815 = vmatpush3.bf16.msra.mxu1 %v3803_v20  ;;  %2830 = vmatprep.mubr.msk.bf16.mxu1 %vm3537_vm0, %v3536_v5  ;;  %s2477_s26 = sshll.u32 %s458_s21, 4  ;;  %s4414_s26 = int_to_ptr.vmem [resolvable:$true] %s2477_s26 }
  0x7b   : > { %2816 = vmatprep.subr.bf16.mxu1 %v3536_v5  ;;  %1255 = vrot.lane.b32.xlu1 %v3780_v12, %s3540_s28  ;;  %s3435_s16 = scalar_lea.vmem %s4414_s26, 64 }
  0x7c   : > { %787 = vmatpush1.bf16.msra.mxu0 %v3806_v21  ;;  %1625 = vrot.lane.b32.xlu0 %v3780_v12, %s3542_s24  ;;  %s2464_s24 = scalar_lea.sflag [#allocation5], %s3754_s6  ;;  %p3436_p1 = scmp.ne.s32.totalorder %s4414_s26, %s3435_s16 }
  0x7d   : > { %788 = vmatprep.subr.bf16.mxu0 %v3814_v23 }
  0x7e   : > { %2817 = vmatpush3.bf16.msra.mxu1 %v3811_v22  ;;  %p3437_p3 = pnand %p3436_p1, %p3724_p2 }
  0x7f   : > { %2818 = vmatprep.subr.bf16.mxu1 %v3536_v5  ;;  %1440 = vrot.lane.b32.xlu1 %v3780_v12, %s3541_s30  ;;  %s4412_s30 = scalar_lea.hbm %s4470_s10, %s2697_s20 }
  0x80   : > { %789 = vmatpush1.bf16.msra.mxu0 %v3821_v24  ;;  %1995 = vrot.lane.b32.xlu0 %v3780_v12, %s3544_s19  ;;  %p3438_p4 = pneg %p3437_p3 }
  0x81   : > { %790 = vmatprep.subr.bf16.mxu0 %v3827_v26 }
  0x82   : > { %2819 = vmatpush3.bf16.msra.mxu1 %v3824_v25 }
  0x83   : > { %2820 = vmatprep.subr.bf16.mxu1 %v3536_v5  ;;  %1810 = vrot.lane.b32.xlu1 %v3780_v12, %s3543_s27  ;;  %s3439_s27 = sshll.u32 %s3545_s17, 4  ;;  %s3440_s27 = int_to_ptr.vmem [resolvable:$false] %s3439_s27 }
  0x84   : > { %791 = vmatpush1.bf16.msra.mxu0 %v3830_v27  ;;  %s3441_s19 = scalar_lea.vmem %s3440_s27, 128  ;;  %p3442_p0 = scmp.lt.s32.totalorder %s4414_s26, %s3440_s27 }
  0x85   : > { %792 = vmatprep.subr.bf16.mxu0 %v3837_v29  ;;  %p3443_p8 = scmp.lt.s32.totalorder %s3441_s19, %s3435_s16 }
  0x86   : > { %2821 = vmatpush3.bf16.msra.mxu1 %v3834_v28 }
  0x87   : > { %2822 = vmatprep.subr.bf16.mxu1 %v3536_v5  ;;  %p3444_p7 = por %p3443_p8, %p3442_p0 }
  0x88   : > { %793 = vmatpush1.bf16.msra.mxu0 %v3840_v30 }
  0x89   : > { %794 = vmatprep.subr.bf16.mxu0 %v3844_v32  ;;  %p3445_p9 = pnand %p3444_p7, %p3438_p4 }
  0x8a   : > { %2823 = vmatpush3.bf16.msra.mxu1 %v3842_v31 }
  0x8b   : > { %2824 = vmatprep.subr.bf16.mxu1 %v3536_v5 }
  0x8c   : > { %795 = vmatpush1.bf16.msra.mxu0 %v3850_v33 }
  0x8d   : > { %796 = vmatprep.subr.bf16.mxu0 %v3854_v35 }
  0x8e   : > { %2825 = vmatpush3.bf16.msra.mxu1 %v3852_v34 }
  0x8f   : > { %2826 = vmatprep.subr.bf16.mxu1 %v3536_v5 }
  0x90   : > { %797 = vmatpush1.bf16.msra.mxu0 %v3860_v36 }
  0x91   : > { %798 = vmatprep.subr.bf16.mxu0 %v3867_v38 }
  0x92   : > { %2827 = vmatpush3.bf16.msra.mxu1 %v3864_v37 }
  0x93   : > { %2828 = vmatprep.subr.bf16.mxu1 %v3536_v5 }
  0x94   : > { %799 = vmatpush1.bf16.msra.mxu0 %v3871_v39 }
  0x95   : > { %2656 = vmatprep.subr.msk.bf16.mxu0 %vm549_vm1, %v3782_v13 }
  0x96   : > { %2829 = vmatpush3.bf16.msra.mxu1 %v3874_v40 }
  0x97   : > { %2834 = vmatprep.subr.bf16.mxu1 %v3536_v5  ;;  %817 = vmatmul.mubr.bf16.vlgmr.msra.gmra.mxu0 %v3535_v3 }
  0x98   : > { %905 = vmatpush1.bf16.msra.mxu0 %v3785_v14  ;;  %922 = vmatprep.mubr.bf16.mxu0 %v3535_v3 }
  0x99   : > { %2831 = vmatmul.mubr.bf16.vlgmr.msra.gmra.mxu1 %v3535_v3  ;;  %972 = vmatprep.subr.bf16.mxu0 %v3787_v15 }
  0x9a   : > { %2835 = vmatpush3.bf16.msra.mxu1 %v3793_v17  ;;  %2836 = vmatprep.mubr.msk.bf16.mxu1 %vm3537_vm0, %v3536_v5 }
  0x9b   : > { %2840 = vmatprep.subr.bf16.mxu1 %v3536_v5 }
  0xe0   : > { %v886_v41 = vpop.permute.xlu0 %885 }
  0xe1   : > { %2657 = vmatmul.mubr.msk.bf16.vlgmr.msra.gmra.mxu0 %vm545_vm2, %v886_v41  ;;  %2837 = vmatmul.mubr.msk.bf16.vlgmr.msra.gmra.mxu1 %vm545_vm2, %v886_v41  ;;  %v516_v41 = vsub.s32 2, %v3773_v4 }
  0xe2   : > { %973 = vmatpush1.bf16.msra.mxu0 %v3796_v18  ;;  %2841 = vmatpush3.bf16.msra.mxu1 %v3803_v20 }
  0xe3   : > { %974 = vmatprep.subr.bf16.mxu0 %v3800_v19  ;;  %2842 = vmatprep.subr.bf16.mxu1 %v3536_v5 }
  0xe4   : > { %1004 = vmatprep.mubr.bf16.mxu0 %v3535_v3  ;;  %2856 = vmatprep.mubr.msk.bf16.mxu1 %vm3537_vm0, %v3536_v5 }
  0xe6   : > { %975 = vmatpush1.bf16.msra.mxu0 %v3806_v21  ;;  %2843 = vmatpush3.bf16.msra.mxu1 %v3811_v22 }
  0xe7   : > { %976 = vmatprep.subr.bf16.mxu0 %v3814_v23  ;;  %2844 = vmatprep.subr.bf16.mxu1 %v3536_v5 }
  0xea   : > { %977 = vmatpush1.bf16.msra.mxu0 %v3821_v24  ;;  %2845 = vmatpush3.bf16.msra.mxu1 %v3824_v25 }
  0xeb   : > { %978 = vmatprep.subr.bf16.mxu0 %v3827_v26  ;;  %2846 = vmatprep.subr.bf16.mxu1 %v3536_v5 }
  0xee   : > { %979 = vmatpush1.bf16.msra.mxu0 %v3830_v27  ;;  %2847 = vmatpush3.bf16.msra.mxu1 %v3834_v28 }
  0xef   : > { %980 = vmatprep.subr.bf16.mxu0 %v3837_v29  ;;  %2848 = vmatprep.subr.bf16.mxu1 %v3536_v5 }
  0xf2   : > { %981 = vmatpush1.bf16.msra.mxu0 %v3840_v30  ;;  %2849 = vmatpush3.bf16.msra.mxu1 %v3842_v31 }
  0xf3   : > { %982 = vmatprep.subr.bf16.mxu0 %v3844_v32  ;;  %2850 = vmatprep.subr.bf16.mxu1 %v3536_v5 }
  0xf6   : > { %983 = vmatpush1.bf16.msra.mxu0 %v3850_v33  ;;  %2851 = vmatpush3.bf16.msra.mxu1 %v3852_v34 }
  0xf7   : > { %984 = vmatprep.subr.bf16.mxu0 %v3854_v35  ;;  %2852 = vmatprep.subr.bf16.mxu1 %v3536_v5 }
  0xfa   : > { %985 = vmatpush1.bf16.msra.mxu0 %v3860_v36  ;;  %2853 = vmatpush3.bf16.msra.mxu1 %v3864_v37 }
  0xfb   : > { %986 = vmatprep.subr.bf16.mxu0 %v3867_v38  ;;  %2854 = vmatprep.subr.bf16.mxu1 %v3536_v5 }
  0xfe   : > { %987 = vmatpush1.bf16.msra.mxu0 %v3871_v39  ;;  %2855 = vmatpush3.bf16.msra.mxu1 %v3874_v40 }
  0xff   : > { %2659 = vmatprep.subr.msk.bf16.mxu0 %vm549_vm1, %v3782_v13  ;;  %2860 = vmatprep.subr.bf16.mxu1 %v3536_v5 }
 0x137   : > { %v593_v42 = vpop.f32.mrf.mxu0 }
 0x138   : > { %v594_v58 = vadd.f32 %v593_v42, %v3938_v53  ;;  %v3952_v42 = vrot.slane %v504_v52, %v516_v41 }
 0x139   : > { %v634_v43 = vpop.f32.mrf.mxu1  ;;  %v595_v44 = vpop.f32.mrf.mxu0 }
 0x13a   : > { %v596_v10 = vadd.f32 %v595_v44, %v3947_v63 }
 0x13b   : > { %v2812_v45 = vpop.f32.mrf.mxu1  ;;  %v597_v46 = vpop.f32.mrf.mxu0 }
 0x13c   : > { %v3954_v46 = vrot.slane %v503_v51, %v516_v41 }
 0x13d   : > { %v637_v47 = vpop.f32.mrf.mxu1  ;;  %v598_v48 = vpop.f32.mrf.mxu0 }
 0x13e   : > { %v635_v50 = vadd.f32 %v634_v43, %v3954_v46 }
 0x13f   : > { %v2813_v49 = vpop.f32.mrf.mxu1 }
 0x157   : > { %v818_v56 = vpop.f32.mrf.mxu0 }
 0x158   : > { %v819_v59 = vadd.f32 %v818_v56, %v3940_v54 }
 0x159   : > { %v859_v57 = vpop.f32.mrf.mxu1  ;;  %v820_v61 = vpop.f32.mrf.mxu0 }
 0x15a   : > { %v865_v0 = vadd.f32 %v819_v59, %v594_v58  ;;  %v821_v7 = vadd.f32 %v820_v61, %v3945_v60  ;;  %v860_v47 = vadd.f32 %v859_v57, %v3952_v42 }
 0x15b   : > { %v2832_v62 = vpop.f32.mrf.mxu1  ;;  %v822_v1 = vpop.f32.mrf.mxu0 }
 0x15c   : > { %v867_v6 = vmul.f32 0.5, %v865_v0  ;;  %v866_v11 = vadd.f32 %v821_v7, %v596_v10  ;;  %v1071_v10 = vpop.permute.xlu0 %1070 }
 0x15d   : > { %v862_v2 = vpop.f32.mrf.mxu1  ;;  %v823_v8 = vpop.f32.mrf.mxu0 }
 0x15e   : > { %3229 = vtanh.f32 %v867_v6  ;;  %v868_v16 = vmul.f32 0.5, %v866_v11 }
 0x15f   : > { %v2833_v9 = vpop.f32.mrf.mxu1 }
 0x160   : > { %3231 = vtanh.f32 %v868_v16 }
 0x16b   : > { %v3230_v45 = vpop.eup %3229 }
 0x16c   : > { %v871_v48 = vadd.f32 1.0, %v3230_v45 }
 0x16d   : > { %v3232_v44 = vpop.eup %3231 }
 0x16e   : > { %v873_v49 = vmul.f32 0.5, %v871_v48  ;;  %v872_v58 = vadd.f32 1.0, %v3232_v44 }
 0x170   : > { %v875_v55 = vmul.f32 %v873_v49, %v860_v47  ;;  %v874_v59 = vmul.f32 0.5, %v872_v58 }
 0x172   : > { %v876_v56 = vadd.f32 %v875_v55, %v635_v50  ;;  %v878_v61 = vsub.f32 1.0, %v874_v59  ;;  %v880_v62 = vmul.f32 0.0, %v874_v59 }
 0x174   : > { %3233 = vtanh.f32 %v876_v56 }
 0x181   : > { %v3234_v4 = vpop.eup %3233 }
 0x182   : > { %v879_v52 = vmul.f32 %v3234_v4, %v878_v61 }
 0x184   : > { %v3958_v0 = vadd.f32 %v880_v62, %v879_v52 }
 0x186   : > { %v971_v51 = vpack.c.bf16 %v3958_v0, %v3958_v0 }
 0x188   : > { %1005 = vmatmul.mubr.bf16.vlgmr.msra.gmra.mxu0 %v971_v51  ;;  %2857 = vmatmul.mubr.bf16.vlgmr.msra.gmra.mxu1 %v971_v51 }
 0x189   : > { %1090 = vmatpush1.bf16.msra.mxu0 %v3785_v14  ;;  %2861 = vmatpush3.bf16.msra.mxu1 %v3793_v17 }
 0x18a   : > { %1107 = vmatprep.mubr.bf16.mxu0 %v3535_v3  ;;  %2862 = vmatprep.mubr.msk.bf16.mxu1 %vm3537_vm0, %v3536_v5 }
 0x18b   : > { %1157 = vmatprep.subr.bf16.mxu0 %v3787_v15  ;;  %2866 = vmatprep.subr.bf16.mxu1 %v3536_v5 }
 0x190   : > { %2660 = vmatmul.mubr.msk.bf16.vlgmr.msra.gmra.mxu0 %vm545_vm2, %v1071_v10  ;;  %2863 = vmatmul.mubr.msk.bf16.vlgmr.msra.gmra.mxu1 %vm545_vm2, %v1071_v10 }
 0x191   : > { %1158 = vmatpush1.bf16.msra.mxu0 %v3796_v18  ;;  %2867 = vmatpush3.bf16.msra.mxu1 %v3803_v20 }
 0x192   : > { %1159 = vmatprep.subr.bf16.mxu0 %v3800_v19  ;;  %2868 = vmatprep.subr.bf16.mxu1 %v3536_v5 }
 0x193   : > { %1189 = vmatprep.mubr.bf16.mxu0 %v3535_v3  ;;  %2882 = vmatprep.mubr.msk.bf16.mxu1 %vm3537_vm0, %v3536_v5 }
 0x195   : > { %1160 = vmatpush1.bf16.msra.mxu0 %v3806_v21  ;;  %2869 = vmatpush3.bf16.msra.mxu1 %v3811_v22 }
 0x196   : > { %1161 = vmatprep.subr.bf16.mxu0 %v3814_v23  ;;  %2870 = vmatprep.subr.bf16.mxu1 %v3536_v5 }
 0x199   : > { %1162 = vmatpush1.bf16.msra.mxu0 %v3821_v24  ;;  %2871 = vmatpush3.bf16.msra.mxu1 %v3824_v25 }
 0x19a   : > { %1163 = vmatprep.subr.bf16.mxu0 %v3827_v26  ;;  %2872 = vmatprep.subr.bf16.mxu1 %v3536_v5 }
 0x19d   : > { %1164 = vmatpush1.bf16.msra.mxu0 %v3830_v27  ;;  %2873 = vmatpush3.bf16.msra.mxu1 %v3834_v28 }
 0x19e   : > { %1165 = vmatprep.subr.bf16.mxu0 %v3837_v29  ;;  %2874 = vmatprep.subr.bf16.mxu1 %v3536_v5 }
 0x1a1   : > { %v924_v43 = vpop.f32.mrf.mxu0  ;;  %v3969_v57 = vpop.f32.mrf.mxu1  ;;  %1166 = vmatpush1.bf16.msra.mxu0 %v3840_v30  ;;  %2875 = vmatpush3.bf16.msra.mxu1 %v3842_v31 }
 0x1a2   : > { %1167 = vmatprep.subr.bf16.mxu0 %v3844_v32  ;;  %2876 = vmatprep.subr.bf16.mxu1 %v3536_v5  ;;  %v925_v41 = vadd.f32 %v924_v43, %v3938_v53 }
 0x1a3   : > { %v926_v1 = vpop.f32.mrf.mxu0  ;;  %v2838_v2 = vpop.f32.mrf.mxu1 }
 0x1a4   : > { %v927_v61 = vadd.f32 %v926_v1, %v3947_v63 }
 0x1a5   : > { %v928_v6 = vpop.f32.mrf.mxu0  ;;  %v968_v7 = vpop.f32.mrf.mxu1  ;;  %1168 = vmatpush1.bf16.msra.mxu0 %v3850_v33  ;;  %2877 = vmatpush3.bf16.msra.mxu1 %v3852_v34 }
 0x1a6   : > { %1169 = vmatprep.subr.bf16.mxu0 %v3854_v35  ;;  %2878 = vmatprep.subr.bf16.mxu1 %v3536_v5  ;;  %v966_v6 = vadd.f32 %v3969_v57, %v3954_v46 }
 0x1a7   : > { %v929_v8 = vpop.f32.mrf.mxu0  ;;  %v2839_v9 = vpop.f32.mrf.mxu1 }
 0x1a9   : > { %1170 = vmatpush1.bf16.msra.mxu0 %v3860_v36  ;;  %2879 = vmatpush3.bf16.msra.mxu1 %v3864_v37 }
 0x1aa   : > { %1171 = vmatprep.subr.bf16.mxu0 %v3867_v38  ;;  %2880 = vmatprep.subr.bf16.mxu1 %v3536_v5 }
 0x1ad   : > { %1172 = vmatpush1.bf16.msra.mxu0 %v3871_v39  ;;  %2881 = vmatpush3.bf16.msra.mxu1 %v3874_v40 }
 0x1ae   : > { %2662 = vmatprep.subr.msk.bf16.mxu0 %vm549_vm1, %v3782_v13  ;;  %2886 = vmatprep.subr.bf16.mxu1 %v3536_v5 }
 0x248   : > { %v1006_v11 = vpop.f32.mrf.mxu0  ;;  %v1047_v16 = vpop.f32.mrf.mxu1 }
 0x249   : > { %v1007_v45 = vadd.f32 %v1006_v11, %v3940_v54  ;;  %v1048_v43 = vadd.f32 %v1047_v16, %v3952_v42 }
 0x24a   : > { %v1008_v47 = vpop.f32.mrf.mxu0  ;;  %v2858_v48 = vpop.f32.mrf.mxu1 }
 0x24b   : > { %v1053_v49 = vadd.f32 %v1007_v45, %v925_v41  ;;  %v1009_v44 = vadd.f32 %v1008_v47, %v3945_v60 }
 0x24c   : > { %v1010_v50 = vpop.f32.mrf.mxu0  ;;  %v1050_v55 = vpop.f32.mrf.mxu1 }
 0x24d   : > { %v1055_v56 = vmul.f32 0.5, %v1053_v49  ;;  %v1054_v4 = vadd.f32 %v1009_v44, %v927_v61 }
 0x24e   : > { %v1011_v58 = vpop.f32.mrf.mxu0  ;;  %v2859_v59 = vpop.f32.mrf.mxu1 }
 0x24f   : > { %3235 = vtanh.f32 %v1055_v56  ;;  %v1056_v62 = vmul.f32 0.5, %v1054_v4  ;;  %v1256_v59 = vpop.permute.xlu1 %1255 }
 0x250   : > { %v4029_v57 = vpop.f32.mrf.mxu1 }
 0x251   : > { %3237 = vtanh.f32 %v1056_v62 }
 0x252   : > { %v2864_v50 = vpop.f32.mrf.mxu1 }
 0x254   : > { %v1153_v56 = vpop.f32.mrf.mxu1 }
 0x256   : > { %v2865_v58 = vpop.f32.mrf.mxu1 }
 0x25c   : > { %v3236_v52 = vpop.eup %3235 }
 0x25d   : > { %v1059_v51 = vadd.f32 1.0, %v3236_v52 }
 0x25e   : > { %v3238_v9 = vpop.eup %3237 }
 0x25f   : > { %v1061_v2 = vmul.f32 0.5, %v1059_v51  ;;  %v1060_v10 = vadd.f32 1.0, %v3238_v9 }
 0x261   : > { %v1063_v7 = vmul.f32 %v1061_v2, %v1048_v43  ;;  %v1062_v11 = vmul.f32 0.5, %v1060_v10 }
 0x263   : > { %v1064_v8 = vadd.f32 %v1063_v7, %v966_v6  ;;  %v1066_v41 = vsub.f32 1.0, %v1062_v11  ;;  %v1068_v45 = vmul.f32 %v1062_v11, %v3958_v0  ;;  %v1109_v0 = vpop.f32.mrf.mxu0 }
 0x264   : > { %v1110_v62 = vadd.f32 %v1109_v0, %v3938_v53 }
 0x265   : > { %3239 = vtanh.f32 %v1064_v8  ;;  %v1111_v49 = vpop.f32.mrf.mxu0 }
 0x267   : > { %v1113_v55 = vpop.f32.mrf.mxu0 }
 0x268   : > { %v1151_v55 = vadd.f32 %v4029_v57, %v3954_v46 }
 0x269   : > { %v1114_v44 = vpop.f32.mrf.mxu0 }
 0x272   : > { %v3240_v1 = vpop.eup %3239 }
 0x273   : > { %v1067_v47 = vmul.f32 %v3240_v1, %v1066_v41  ;;  %v1112_v41 = vadd.f32 %v1111_v49, %v3947_v63 }
 0x275   : > { %v4018_v48 = vadd.f32 %v1068_v45, %v1067_v47 }
 0x277   : > { %v1156_v16 = vpack.c.bf16 %v4018_v48, %v4018_v48 }
 0x279   : > { %1190 = vmatmul.mubr.bf16.vlgmr.msra.gmra.mxu0 %v1156_v16  ;;  %2883 = vmatmul.mubr.bf16.vlgmr.msra.gmra.mxu1 %v1156_v16 }
 0x27a   : > { %1275 = vmatpush1.bf16.msra.mxu0 %v3785_v14  ;;  %2887 = vmatpush3.bf16.msra.mxu1 %v3793_v17 }
 0x27b   : > { %1292 = vmatprep.mubr.bf16.mxu0 %v3535_v3  ;;  %2888 = vmatprep.mubr.msk.bf16.mxu1 %vm3537_vm0, %v3536_v5 }
 0x27c   : > { %1342 = vmatprep.subr.bf16.mxu0 %v3787_v15  ;;  %2892 = vmatprep.subr.bf16.mxu1 %v3536_v5 }
 0x281   : > { %2663 = vmatmul.mubr.msk.bf16.vlgmr.msra.gmra.mxu0 %vm545_vm2, %v1256_v59  ;;  %2889 = vmatmul.mubr.msk.bf16.vlgmr.msra.gmra.mxu1 %vm545_vm2, %v1256_v59 }
 0x282   : > { %1343 = vmatpush1.bf16.msra.mxu0 %v3796_v18  ;;  %2893 = vmatpush3.bf16.msra.mxu1 %v3803_v20 }
 0x283   : > { %1344 = vmatprep.subr.bf16.mxu0 %v3800_v19  ;;  %2894 = vmatprep.subr.bf16.mxu1 %v3536_v5 }
 0x284   : > { %1374 = vmatprep.mubr.bf16.mxu0 %v3535_v3  ;;  %2908 = vmatprep.mubr.msk.bf16.mxu1 %vm3537_vm0, %v3536_v5 }
 0x286   : > { %1345 = vmatpush1.bf16.msra.mxu0 %v3806_v21  ;;  %2895 = vmatpush3.bf16.msra.mxu1 %v3811_v22 }
 0x287   : > { %1346 = vmatprep.subr.bf16.mxu0 %v3814_v23  ;;  %2896 = vmatprep.subr.bf16.mxu1 %v3536_v5 }
 0x28a   : > { %1347 = vmatpush1.bf16.msra.mxu0 %v3821_v24  ;;  %2897 = vmatpush3.bf16.msra.mxu1 %v3824_v25 }
 0x28b   : > { %1348 = vmatprep.subr.bf16.mxu0 %v3827_v26  ;;  %2898 = vmatprep.subr.bf16.mxu1 %v3536_v5 }
 0x28e   : > { %1349 = vmatpush1.bf16.msra.mxu0 %v3830_v27  ;;  %2899 = vmatpush3.bf16.msra.mxu1 %v3834_v28 }
 0x28f   : > { %1350 = vmatprep.subr.bf16.mxu0 %v3837_v29  ;;  %2900 = vmatprep.subr.bf16.mxu1 %v3536_v5 }
 0x292   : > { %1351 = vmatpush1.bf16.msra.mxu0 %v3840_v30  ;;  %2901 = vmatpush3.bf16.msra.mxu1 %v3842_v31 }
 0x293   : > { %1352 = vmatprep.subr.bf16.mxu0 %v3844_v32  ;;  %2902 = vmatprep.subr.bf16.mxu1 %v3536_v5 }
 0x296   : > { %1353 = vmatpush1.bf16.msra.mxu0 %v3850_v33  ;;  %2903 = vmatpush3.bf16.msra.mxu1 %v3852_v34 }
 0x297   : > { %1354 = vmatprep.subr.bf16.mxu0 %v3854_v35  ;;  %2904 = vmatprep.subr.bf16.mxu1 %v3536_v5 }
 0x29a   : > { %1355 = vmatpush1.bf16.msra.mxu0 %v3860_v36  ;;  %2905 = vmatpush3.bf16.msra.mxu1 %v3864_v37 }
 0x29b   : > { %1356 = vmatprep.subr.bf16.mxu0 %v3867_v38  ;;  %2906 = vmatprep.subr.bf16.mxu1 %v3536_v5 }
 0x29e   : > { %1357 = vmatpush1.bf16.msra.mxu0 %v3871_v39  ;;  %2907 = vmatpush3.bf16.msra.mxu1 %v3874_v40 }
 0x29f   : > { %2665 = vmatprep.subr.msk.bf16.mxu0 %vm549_vm1, %v3782_v13  ;;  %2912 = vmatprep.subr.bf16.mxu1 %v3536_v5 }
 0x339   : > { %v1191_v61 = vpop.f32.mrf.mxu0  ;;  %v1232_v4 = vpop.f32.mrf.mxu1 }
 0x33a   : > { %v1192_v52 = vadd.f32 %v1191_v61, %v3940_v54  ;;  %v1233_v0 = vadd.f32 %v1232_v4, %v3952_v42 }
 0x33b   : > { %v1193_v51 = vpop.f32.mrf.mxu0  ;;  %v2884_v43 = vpop.f32.mrf.mxu1 }
 0x33c   : > { %v1238_v2 = vadd.f32 %v1192_v52, %v1110_v62  ;;  %v1194_v9 = vadd.f32 %v1193_v51, %v3945_v60 }
 0x33d   : > { %v1195_v6 = vpop.f32.mrf.mxu0  ;;  %v1235_v7 = vpop.f32.mrf.mxu1 }
 0x33e   : > { %v1240_v8 = vmul.f32 0.5, %v1238_v2  ;;  %v1239_v1 = vadd.f32 %v1194_v9, %v1112_v41 }
 0x33f   : > { %v1196_v10 = vpop.f32.mrf.mxu0  ;;  %v2885_v11 = vpop.f32.mrf.mxu1 }
 0x340   : > { %3241 = vtanh.f32 %v1240_v8  ;;  %v1241_v45 = vmul.f32 0.5, %v1239_v1  ;;  %v1441_v11 = vpop.permute.xlu1 %1440 }
 0x341   : > { %v4089_v57 = vpop.f32.mrf.mxu1 }
 0x342   : > { %3243 = vtanh.f32 %v1241_v45 }
 0x343   : > { %v2890_v6 = vpop.f32.mrf.mxu1 }
 0x345   : > { %v1338_v8 = vpop.f32.mrf.mxu1 }
 0x347   : > { %v2891_v10 = vpop.f32.mrf.mxu1 }
 0x34d   : > { %v3242_v47 = vpop.eup %3241 }
 0x34e   : > { %v1244_v16 = vadd.f32 1.0, %v3242_v47 }
 0x34f   : > { %v3244_v58 = vpop.eup %3243 }
 0x350   : > { %v1246_v50 = vmul.f32 0.5, %v1244_v16  ;;  %v1245_v59 = vadd.f32 1.0, %v3244_v58 }
 0x352   : > { %v1248_v56 = vmul.f32 %v1246_v50, %v1233_v0  ;;  %v1247_v61 = vmul.f32 0.5, %v1245_v59 }
 0x354   : > { %v1249_v44 = vadd.f32 %v1248_v56, %v1151_v55  ;;  %v1251_v62 = vsub.f32 1.0, %v1247_v61  ;;  %v1253_v52 = vmul.f32 %v1247_v61, %v4018_v48  ;;  %v1294_v48 = vpop.f32.mrf.mxu0 }
 0x355   : > { %v1295_v45 = vadd.f32 %v1294_v48, %v3938_v53 }
 0x356   : > { %3245 = vtanh.f32 %v1249_v44  ;;  %v1296_v2 = vpop.f32.mrf.mxu0 }
 0x358   : > { %v1298_v7 = vpop.f32.mrf.mxu0 }
 0x359   : > { %v1336_v7 = vadd.f32 %v4089_v57, %v3954_v46 }
 0x35a   : > { %v1299_v9 = vpop.f32.mrf.mxu0 }
 0x363   : > { %v3246_v49 = vpop.eup %3245 }
 0x364   : > { %v1252_v51 = vmul.f32 %v3246_v49, %v1251_v62  ;;  %v1297_v62 = vadd.f32 %v1296_v2, %v3947_v63 }
 0x366   : > { %v4078_v43 = vadd.f32 %v1253_v52, %v1252_v51 }
 0x368   : > { %v1341_v4 = vpack.c.bf16 %v4078_v43, %v4078_v43 }
 0x36a   : > { %1375 = vmatmul.mubr.bf16.vlgmr.msra.gmra.mxu0 %v1341_v4  ;;  %2909 = vmatmul.mubr.bf16.vlgmr.msra.gmra.mxu1 %v1341_v4 }
 0x36b   : > { %1460 = vmatpush1.bf16.msra.mxu0 %v3785_v14  ;;  %2913 = vmatpush3.bf16.msra.mxu1 %v3793_v17 }
 0x36c   : > { %1477 = vmatprep.mubr.bf16.mxu0 %v3535_v3  ;;  %2914 = vmatprep.mubr.msk.bf16.mxu1 %vm3537_vm0, %v3536_v5 }
 0x36d   : > { %1527 = vmatprep.subr.bf16.mxu0 %v3787_v15  ;;  %2918 = vmatprep.subr.bf16.mxu1 %v3536_v5 }
 0x372   : > { %2666 = vmatmul.mubr.msk.bf16.vlgmr.msra.gmra.mxu0 %vm545_vm2, %v1441_v11  ;;  %2915 = vmatmul.mubr.msk.bf16.vlgmr.msra.gmra.mxu1 %vm545_vm2, %v1441_v11 }
 0x373   : > { %1528 = vmatpush1.bf16.msra.mxu0 %v3796_v18  ;;  %2919 = vmatpush3.bf16.msra.mxu1 %v3803_v20 }
 0x374   : > { %1529 = vmatprep.subr.bf16.mxu0 %v3800_v19  ;;  %2920 = vmatprep.subr.bf16.mxu1 %v3536_v5 }
 0x375   : > { %1559 = vmatprep.mubr.bf16.mxu0 %v3535_v3  ;;  %2934 = vmatprep.mubr.msk.bf16.mxu1 %vm3537_vm0, %v3536_v5 }
 0x377   : > { %1530 = vmatpush1.bf16.msra.mxu0 %v3806_v21  ;;  %2921 = vmatpush3.bf16.msra.mxu1 %v3811_v22 }
 0x378   : > { %1531 = vmatprep.subr.bf16.mxu0 %v3814_v23  ;;  %2922 = vmatprep.subr.bf16.mxu1 %v3536_v5 }
 0x37b   : > { %1532 = vmatpush1.bf16.msra.mxu0 %v3821_v24  ;;  %2923 = vmatpush3.bf16.msra.mxu1 %v3824_v25 }
 0x37c   : > { %1533 = vmatprep.subr.bf16.mxu0 %v3827_v26  ;;  %2924 = vmatprep.subr.bf16.mxu1 %v3536_v5 }
 0x37f   : > { %1534 = vmatpush1.bf16.msra.mxu0 %v3830_v27  ;;  %2925 = vmatpush3.bf16.msra.mxu1 %v3834_v28 }
 0x380   : > { %1535 = vmatprep.subr.bf16.mxu0 %v3837_v29  ;;  %2926 = vmatprep.subr.bf16.mxu1 %v3536_v5 }
 0x383   : > { %1536 = vmatpush1.bf16.msra.mxu0 %v3840_v30  ;;  %2927 = vmatpush3.bf16.msra.mxu1 %v3842_v31 }
 0x384   : > { %1537 = vmatprep.subr.bf16.mxu0 %v3844_v32  ;;  %2928 = vmatprep.subr.bf16.mxu1 %v3536_v5 }
 0x387   : > { %1538 = vmatpush1.bf16.msra.mxu0 %v3850_v33  ;;  %2929 = vmatpush3.bf16.msra.mxu1 %v3852_v34 }
 0x388   : > { %1539 = vmatprep.subr.bf16.mxu0 %v3854_v35  ;;  %2930 = vmatprep.subr.bf16.mxu1 %v3536_v5 }
 0x38b   : > { %1540 = vmatpush1.bf16.msra.mxu0 %v3860_v36  ;;  %2931 = vmatpush3.bf16.msra.mxu1 %v3864_v37 }
 0x38c   : > { %1541 = vmatprep.subr.bf16.mxu0 %v3867_v38  ;;  %2932 = vmatprep.subr.bf16.mxu1 %v3536_v5 }
 0x38f   : > { %1542 = vmatpush1.bf16.msra.mxu0 %v3871_v39  ;;  %2933 = vmatpush3.bf16.msra.mxu1 %v3874_v40 }
 0x390   : > { %2668 = vmatprep.subr.msk.bf16.mxu0 %vm549_vm1, %v3782_v13  ;;  %2938 = vmatprep.subr.bf16.mxu1 %v3536_v5 }
 0x42a   : > { %v1376_v41 = vpop.f32.mrf.mxu0  ;;  %v1417_v1 = vpop.f32.mrf.mxu1 }
 0x42b   : > { %v1377_v47 = vadd.f32 %v1376_v41, %v3940_v54  ;;  %v1418_v48 = vadd.f32 %v1417_v1, %v3952_v42 }
 0x42c   : > { %v1378_v16 = vpop.f32.mrf.mxu0  ;;  %v2910_v0 = vpop.f32.mrf.mxu1 }
 0x42d   : > { %v1423_v50 = vadd.f32 %v1377_v47, %v1295_v45  ;;  %v1379_v58 = vadd.f32 %v1378_v16, %v3945_v60 }
 0x42e   : > { %v1380_v55 = vpop.f32.mrf.mxu0  ;;  %v1420_v56 = vpop.f32.mrf.mxu1 }
 0x42f   : > { %v1425_v44 = vmul.f32 0.5, %v1423_v50  ;;  %v1424_v49 = vadd.f32 %v1379_v58, %v1297_v62 }
 0x430   : > { %v1381_v59 = vpop.f32.mrf.mxu0  ;;  %v2911_v61 = vpop.f32.mrf.mxu1 }
 0x431   : > { %3247 = vtanh.f32 %v1425_v44  ;;  %v1426_v52 = vmul.f32 0.5, %v1424_v49  ;;  %v1626_v61 = vpop.permute.xlu0 %1625 }
 0x432   : > { %v4149_v57 = vpop.f32.mrf.mxu1 }
 0x433   : > { %3249 = vtanh.f32 %v1426_v52 }
 0x434   : > { %v2916_v55 = vpop.f32.mrf.mxu1 }
 0x435   : > { %v4235_v55 = vld [vmem:[#allocation8 + $0x98] ss:$12 sps:$4 sm:$0xff]  }
 0x436   : > { %v1523_v44 = vpop.f32.mrf.mxu1 }
 0x437   : > { %v4242_v44 = vld [vmem:[#allocation8 + $0x78] ss:$12 sps:$4 sm:$0xff]  }
 0x438   : > { %v2917_v59 = vpop.f32.mrf.mxu1 }
 0x439   : > { %v4248_v59 = vld [vmem:[#allocation8 + $0x64] ss:$12 sps:$4 sm:$0xff]  }
 0x43e   : > { %v3248_v51 = vpop.eup %3247 }
 0x43f   : > { %v1429_v4 = vadd.f32 1.0, %v3248_v51 }
 0x440   : > { %v3250_v10 = vpop.eup %3249 }
 0x441   : > { %v1431_v6 = vmul.f32 0.5, %v1429_v4  ;;  %v1430_v11 = vadd.f32 1.0, %v3250_v10 }
 0x443   : > { %v1433_v8 = vmul.f32 %v1431_v6, %v1418_v48  ;;  %v1432_v41 = vmul.f32 0.5, %v1430_v11 }
 0x445   : > { %v1434_v9 = vadd.f32 %v1433_v8, %v1336_v7  ;;  %v1436_v45 = vsub.f32 1.0, %v1432_v41  ;;  %v1438_v47 = vmul.f32 %v1432_v41, %v4078_v43  ;;  %v1479_v43 = vpop.f32.mrf.mxu0  ;;  %v4207_v8 = vld [vmem:[#allocation8 + $0xac] ss:$12 sps:$4 sm:$0xff]  }
 0x447   : > { %3251 = vtanh.f32 %v1434_v9  ;;  %v1481_v50 = vpop.f32.mrf.mxu0 }
 0x449   : > { %v1483_v56 = vpop.f32.mrf.mxu0 }
 0x44a   : > { %v4238_v56 = vld [vmem:[#allocation8 + $0x7c] ss:$12 sps:$4 sm:$0xff]  }
 0x44b   : > { %v1484_v58 = vpop.f32.mrf.mxu0 }
 0x44c   : > { %v4245_v58 = vld [vmem:[#allocation8 + $0x80] ss:$12 sps:$4 sm:$0xff]  }
 0x454   : > { %v3252_v2 = vpop.eup %3251 }
 0x455   : > { %v1437_v16 = vmul.f32 %v3252_v2, %v1436_v45 }
 0x457   : > { %v4138_v0 = vadd.f32 %v1438_v47, %v1437_v16 }
 0x459   : > { %v1526_v1 = vpack.c.bf16 %v4138_v0, %v4138_v0 }
 0x45b   : > { %1560 = vmatmul.mubr.bf16.vlgmr.msra.gmra.mxu0 %v1526_v1  ;;  %2935 = vmatmul.mubr.bf16.vlgmr.msra.gmra.mxu1 %v1526_v1  ;;  %v4219_v1 = vld [vmem:[#allocation8 + $0xa8] ss:$12 sps:$4 sm:$0xff]  }
 0x45c   : > { %1645 = vmatpush1.bf16.msra.mxu0 %v3785_v14  ;;  %2939 = vmatpush3.bf16.msra.mxu1 %v3793_v17 }
 0x45d   : > { %1662 = vmatprep.mubr.bf16.mxu0 %v3535_v3  ;;  %2940 = vmatprep.mubr.msk.bf16.mxu1 %vm3537_vm0, %v3536_v5 }
 0x45e   : > { %1712 = vmatprep.subr.bf16.mxu0 %v3787_v15  ;;  %2944 = vmatprep.subr.bf16.mxu1 %v3536_v5 }
 0x463   : > { %2669 = vmatmul.mubr.msk.bf16.vlgmr.msra.gmra.mxu0 %vm545_vm2, %v1626_v61  ;;  %2941 = vmatmul.mubr.msk.bf16.vlgmr.msra.gmra.mxu1 %vm545_vm2, %v1626_v61  ;;  %v4252_v61 = vld [vmem:[#allocation8 + $0x60] ss:$12 sps:$4 sm:$0xff]  }
 0x464   : > { %1713 = vmatpush1.bf16.msra.mxu0 %v3796_v18  ;;  %2945 = vmatpush3.bf16.msra.mxu1 %v3803_v20 }
 0x465   : > { %1714 = vmatprep.subr.bf16.mxu0 %v3800_v19  ;;  %2946 = vmatprep.subr.bf16.mxu1 %v3536_v5  ;;  %v1480_v19 = vadd.f32 %v1479_v43, %v3938_v53  ;;  %v4222_v43 = vld [vmem:[#allocation8 + $0xb0] ss:$12 sps:$4 sm:$0xff]  }
 0x466   : > { %1744 = vmatprep.mubr.bf16.mxu0 %v3535_v3  ;;  %2960 = vmatprep.mubr.msk.bf16.mxu1 %vm3537_vm0, %v3536_v5 }
 0x468   : > { %1715 = vmatpush1.bf16.msra.mxu0 %v3806_v21  ;;  %2947 = vmatpush3.bf16.msra.mxu1 %v3811_v22 }
 0x469   : > { %1716 = vmatprep.subr.bf16.mxu0 %v3814_v23  ;;  %2948 = vmatprep.subr.bf16.mxu1 %v3536_v5 }
 0x46c   : > { %1717 = vmatpush1.bf16.msra.mxu0 %v3821_v24  ;;  %2949 = vmatpush3.bf16.msra.mxu1 %v3824_v25 }
 0x46d   : > { %1718 = vmatprep.subr.bf16.mxu0 %v3827_v26  ;;  %2950 = vmatprep.subr.bf16.mxu1 %v3536_v5 }
 0x470   : > { %1719 = vmatpush1.bf16.msra.mxu0 %v3830_v27  ;;  %2951 = vmatpush3.bf16.msra.mxu1 %v3834_v28 }
 0x471   : > { %1720 = vmatprep.subr.bf16.mxu0 %v3837_v29  ;;  %2952 = vmatprep.subr.bf16.mxu1 %v3536_v5 }
 0x474   : > { %1721 = vmatpush1.bf16.msra.mxu0 %v3840_v30  ;;  %2953 = vmatpush3.bf16.msra.mxu1 %v3842_v31  ;;  %v1482_v30 = vadd.f32 %v1481_v50, %v3947_v63  ;;  %v4232_v50 = vld [vmem:[#allocation8 + $0x90] ss:$12 sps:$4 sm:$0xff]  }
 0x475   : > { %1722 = vmatprep.subr.bf16.mxu0 %v3844_v32  ;;  %2954 = vmatprep.subr.bf16.mxu1 %v3536_v5 }
 0x478   : > { %1723 = vmatpush1.bf16.msra.mxu0 %v3850_v33  ;;  %2955 = vmatpush3.bf16.msra.mxu1 %v3852_v34 }
 0x479   : > { %1724 = vmatprep.subr.bf16.mxu0 %v3854_v35  ;;  %2956 = vmatprep.subr.bf16.mxu1 %v3536_v5 }
 0x47c   : > { %1725 = vmatpush1.bf16.msra.mxu0 %v3860_v36  ;;  %2957 = vmatpush3.bf16.msra.mxu1 %v3864_v37  ;;  %v1521_v37 = vadd.f32 %v4149_v57, %v3954_v46  ;;  %v4225_v57 = vld [vmem:[#allocation8 + $0x94] ss:$12 sps:$4 sm:$0xff]  }
 0x47d   : > { %1726 = vmatprep.subr.bf16.mxu0 %v3867_v38  ;;  %2958 = vmatprep.subr.bf16.mxu1 %v3536_v5 }
 0x480   : > { %1727 = vmatpush1.bf16.msra.mxu0 %v3871_v39  ;;  %2959 = vmatpush3.bf16.msra.mxu1 %v3874_v40 }
 0x481   : > { %2671 = vmatprep.subr.msk.bf16.mxu0 %vm549_vm1, %v3782_v13  ;;  %2964 = vmatprep.subr.bf16.mxu1 %v3536_v5 }
 0x51b   : > { %v1561_v15 = vpop.f32.mrf.mxu0  ;;  %v1602_v18 = vpop.f32.mrf.mxu1 }
 0x51c   : > { %v1562_v20 = vadd.f32 %v1561_v15, %v3940_v54  ;;  %v1603_v35 = vadd.f32 %v1602_v18, %v3952_v42  ;;  %v4255_v15 = vld [vmem:[#allocation8 + $0x68] ss:$12 sps:$4 sm:$0xff]   ;;  %v4258_v18 = vld [vmem:[#allocation8 + $0x4c] ss:$12 sps:$4 sm:$0xff]  }
 0x51d   : > { %v1563_v21 = vpop.f32.mrf.mxu0  ;;  %v2936_v22 = vpop.f32.mrf.mxu1 }
 0x51e   : > { %v1608_v23 = vadd.f32 %v1562_v20, %v1480_v19  ;;  %v1564_v27 = vadd.f32 %v1563_v21, %v3945_v60  ;;  %v4262_v19 = vld [vmem:[#allocation8 + $0x48] ss:$12 sps:$4 sm:$0xff]   ;;  %v4265_v20 = vld [vmem:[#allocation8 + $0x50] ss:$12 sps:$4 sm:$0xff]  }
 0x51f   : > { %v1565_v24 = vpop.f32.mrf.mxu0  ;;  %v1605_v25 = vpop.f32.mrf.mxu1  ;;  %v4268_v21 = vld [vmem:[#allocation8 + $0x34] ss:$12 sps:$4 sm:$0xff]   ;;  %v4272_v22 = vld [vmem:[#allocation8 + $0x30] ss:$12 sps:$4 sm:$0xff]  }
 0x520   : > { %v1610_v26 = vmul.f32 0.5, %v1608_v23  ;;  %v1609_v31 = vadd.f32 %v1564_v27, %v1482_v30  ;;  %v4275_v23 = vld [vmem:[#allocation8 + $0x38] ss:$12 sps:$4 sm:$0xff]   ;;  %v4278_v24 = vld [vmem:[#allocation8 + $0x1c] ss:$12 sps:$4 sm:$0xff]  }
 0x521   : > { %v1566_v28 = vpop.f32.mrf.mxu0  ;;  %v2937_v29 = vpop.f32.mrf.mxu1  ;;  %v4282_v25 = vld [vmem:[#allocation8 + $0x18] ss:$12 sps:$4 sm:$0xff]  }
 0x522   : > { %3253 = vtanh.f32 %v1610_v26  ;;  %v1611_v32 = vmul.f32 0.5, %v1609_v31  ;;  %v4285_v26 = vld [vmem:[#allocation8 + $0x20] ss:$12 sps:$4 sm:$0xff]   ;;  %v4288_v27 = vld [vmem:[#allocation8 + $0x4] ss:$12 sps:$4 sm:$0xff]  }
 0x523   : > { %v4211_v9 = vpop.f32.mrf.mxu0  ;;  %v4213_v10 = vpop.f32.mrf.mxu1  ;;  %v4292_v28 = vld [vmem:[#allocation8] ss:$12 sps:$4 sm:$0xff]   ;;  %v4295_v29 = vld [vmem:[#allocation8 + $0x8] ss:$12 sps:$4 sm:$0xff]  }
 0x524   : > { %3255 = vtanh.f32 %v1611_v32  ;;  %v1665_v32 = vadd.f32 %v4211_v9, %v3938_v53  ;;  %v1706_v9 = vadd.f32 %v4213_v10, %v3954_v46 }
 0x525   : > { %v4215_v11 = vpop.f32.mrf.mxu0  ;;  %v2942_v41 = vpop.f32.mrf.mxu1 }
 0x526   : > { %v1667_v12 = vadd.f32 %v4215_v11, %v3947_v63 }
 0x527   : > { %v1668_v45 = vpop.f32.mrf.mxu0  ;;  %v1708_v2 = vpop.f32.mrf.mxu1 }
 0x529   : > { %v1669_v47 = vpop.f32.mrf.mxu0  ;;  %v2943_v16 = vpop.f32.mrf.mxu1 }
 0x52f   : > { %v3254_v33 = vpop.eup %3253 }
 0x530   : > { %v1614_v34 = vadd.f32 1.0, %v3254_v33 }
 0x531   : > { %v3256_v40 = vpop.eup %3255 }
 0x532   : > { %v1616_v36 = vmul.f32 0.5, %v1614_v34  ;;  %v1615_v62 = vadd.f32 1.0, %v3256_v40 }
 0x534   : > { %v1618_v38 = vmul.f32 %v1616_v36, %v1603_v35  ;;  %v1617_v49 = vmul.f32 0.5, %v1615_v62 }
 0x536   : > { %v1619_v39 = vadd.f32 %v1618_v38, %v1521_v37  ;;  %v1621_v52 = vsub.f32 1.0, %v1617_v49  ;;  %v1623_v4 = vmul.f32 %v1617_v49, %v4138_v0  ;;  %v1811_v0 = vpop.permute.xlu1 %1810 }
 0x538   : > { %3257 = vtanh.f32 %v1619_v39 }
 0x545   : > { %v3258_v51 = vpop.eup %3257 }
 0x546   : > { %v1622_v48 = vmul.f32 %v3258_v51, %v1621_v52 }
 0x548   : > { %v4198_v6 = vadd.f32 %v1623_v4, %v1622_v48 }
 0x54a   : > { %v1711_v7 = vpack.c.bf16 %v4198_v6, %v4198_v6 }
 0x54c   : > { %1745 = vmatmul.mubr.bf16.vlgmr.msra.gmra.mxu0 %v1711_v7  ;;  %2961 = vmatmul.mubr.bf16.vlgmr.msra.gmra.mxu1 %v1711_v7 }
 0x54d   : > { %1830 = vmatpush1.bf16.msra.mxu0 %v3785_v14  ;;  %2965 = vmatpush3.bf16.msra.mxu1 %v3793_v17 }
 0x54e   : > { %1847 = vmatprep.mubr.bf16.mxu0 %v3535_v3  ;;  %2966 = vmatprep.mubr.msk.bf16.mxu1 %vm3537_vm0, %v3536_v5 }
 0x54f   : > { %1897 = vmatprep.subr.bf16.mxu0 %v4207_v8  ;;  %2970 = vmatprep.subr.bf16.mxu1 %v3536_v5 }
 0x554   : > { %2672 = vmatmul.mubr.msk.bf16.vlgmr.msra.gmra.mxu0 %vm545_vm2, %v1811_v0  ;;  %2967 = vmatmul.mubr.msk.bf16.vlgmr.msra.gmra.mxu1 %vm545_vm2, %v1811_v0 }
 0x555   : > { %1898 = vmatpush1.bf16.msra.mxu0 %v4219_v1  ;;  %2971 = vmatpush3.bf16.msra.mxu1 %v4222_v43 }
 0x556   : > { %1899 = vmatprep.subr.bf16.mxu0 %v4225_v57  ;;  %2972 = vmatprep.subr.bf16.mxu1 %v3536_v5 }
 0x557   : > { %1929 = vmatprep.mubr.bf16.mxu0 %v3535_v3  ;;  %2986 = vmatprep.mubr.msk.bf16.mxu1 %vm3537_vm0, %v3536_v5 }
 0x559   : > { %1900 = vmatpush1.bf16.msra.mxu0 %v4232_v50  ;;  %2973 = vmatpush3.bf16.msra.mxu1 %v4235_v55 }
 0x55a   : > { %1901 = vmatprep.subr.bf16.mxu0 %v4238_v56  ;;  %2974 = vmatprep.subr.bf16.mxu1 %v3536_v5 }
 0x55d   : > { %1902 = vmatpush1.bf16.msra.mxu0 %v4242_v44  ;;  %2975 = vmatpush3.bf16.msra.mxu1 %v4245_v58 }
 0x55e   : > { %1903 = vmatprep.subr.bf16.mxu0 %v4248_v59  ;;  %2976 = vmatprep.subr.bf16.mxu1 %v3536_v5 }
 0x561   : > { %1904 = vmatpush1.bf16.msra.mxu0 %v4252_v61  ;;  %2977 = vmatpush3.bf16.msra.mxu1 %v4255_v15 }
 0x562   : > { %1905 = vmatprep.subr.bf16.mxu0 %v4258_v18  ;;  %2978 = vmatprep.subr.bf16.mxu1 %v3536_v5 }
 0x565   : > { %1906 = vmatpush1.bf16.msra.mxu0 %v4262_v19  ;;  %2979 = vmatpush3.bf16.msra.mxu1 %v4265_v20 }
 0x566   : > { %1907 = vmatprep.subr.bf16.mxu0 %v4268_v21  ;;  %2980 = vmatprep.subr.bf16.mxu1 %v3536_v5 }
 0x569   : > { %1908 = vmatpush1.bf16.msra.mxu0 %v4272_v22  ;;  %2981 = vmatpush3.bf16.msra.mxu1 %v4275_v23 }
 0x56a   : > { %1909 = vmatprep.subr.bf16.mxu0 %v4278_v24  ;;  %2982 = vmatprep.subr.bf16.mxu1 %v3536_v5 }
 0x56d   : > { %1910 = vmatpush1.bf16.msra.mxu0 %v4282_v25  ;;  %2983 = vmatpush3.bf16.msra.mxu1 %v4285_v26 }
 0x56e   : > { %1911 = vmatprep.subr.bf16.mxu0 %v4288_v27  ;;  %2984 = vmatprep.subr.bf16.mxu1 %v3536_v5 }
 0x571   : > { %1912 = vmatpush1.bf16.msra.mxu0 %v4292_v28  ;;  %2985 = vmatpush3.bf16.msra.mxu1 %v4295_v29 }
 0x572   : > { %2674 = vmatprep.subr.msk.bf16.mxu0 %vm549_vm1, %v3782_v13  ;;  %2990 = vmatprep.subr.bf16.mxu1 %v3536_v5 }
 0x60c   : > { %v1746_v30 = vpop.f32.mrf.mxu0  ;;  %v1787_v31 = vpop.f32.mrf.mxu1 }
 0x60d   : > { %v1747_v33 = vadd.f32 %v1746_v30, %v3940_v54  ;;  %v1788_v48 = vadd.f32 %v1787_v31, %v3952_v42 }
 0x60e   : > { %v1748_v34 = vpop.f32.mrf.mxu0  ;;  %v2962_v35 = vpop.f32.mrf.mxu1 }
 0x60f   : > { %v1793_v36 = vadd.f32 %v1747_v33, %v1665_v32  ;;  %v1749_v13 = vadd.f32 %v1748_v34, %v3945_v60 }
 0x610   : > { %v1750_v37 = vpop.f32.mrf.mxu0  ;;  %v1790_v38 = vpop.f32.mrf.mxu1 }
 0x611   : > { %v1795_v39 = vmul.f32 0.5, %v1793_v36  ;;  %v1794_v49 = vadd.f32 %v1749_v13, %v1667_v12 }
 0x612   : > { %v1751_v40 = vpop.f32.mrf.mxu0  ;;  %v2963_v62 = vpop.f32.mrf.mxu1 }
 0x613   : > { %3259 = vtanh.f32 %v1795_v39  ;;  %v1796_v52 = vmul.f32 0.5, %v1794_v49  ;;  %v1996_v39 = vpop.permute.xlu0 %1995 }
 0x614   : > { %v4323_v10 = vpop.f32.mrf.mxu1 }
 0x615   : > { %3261 = vtanh.f32 %v1796_v52 }
 0x616   : > { %v2968_v35 = vpop.f32.mrf.mxu1 }
 0x618   : > { %v1893_v37 = vpop.f32.mrf.mxu1 }
 0x620   : > { %v3260_v51 = vpop.eup %3259 }
 0x621   : > { %v1799_v4 = vadd.f32 1.0, %v3260_v51 }
 0x622   : > { %v3262_v2 = vpop.eup %3261 }
 0x623   : > { %v1801_v7 = vmul.f32 0.5, %v1799_v4  ;;  %v1800_v47 = vadd.f32 1.0, %v3262_v2 }
 0x625   : > { %v1803_v41 = vmul.f32 %v1801_v7, %v1788_v48  ;;  %v1802_v16 = vmul.f32 0.5, %v1800_v47  ;;  %v3213_v47 = vld [vmem:[#allocation9 + $0x38] sm:$0xff]  }
 0x627   : > { %v1804_v45 = vadd.f32 %v1803_v41, %v1706_v9  ;;  %v1806_v0 = vsub.f32 1.0, %v1802_v16  ;;  %v1808_v30 = vmul.f32 %v1802_v16, %v4198_v6  ;;  %v1849_v6 = vpop.f32.mrf.mxu0  ;;  %v3214_v16 = vld [vmem:[#allocation9 + $0x30] sm:$0xff]  }
 0x629   : > { %3263 = vtanh.f32 %v1804_v45  ;;  %v1851_v34 = vpop.f32.mrf.mxu0 }
 0x62b   : > { %v1853_v36 = vpop.f32.mrf.mxu0 }
 0x62d   : > { %v1854_v38 = vpop.f32.mrf.mxu0 }
 0x636   : > { %v3264_v11 = vpop.eup %3263 }
 0x637   : > { %v1807_v32 = vmul.f32 %v3264_v11, %v1806_v0  ;;  %v3215_v0 = vld [vmem:[#allocation9 + $0x28] sm:$0xff]   ;;  %v3216_v11 = vld [vmem:[#allocation9 + $0x20] sm:$0xff]  }
 0x639   : > { %v4312_v33 = vadd.f32 %v1808_v30, %v1807_v32  ;;  %v3217_v30 = vld [vmem:[#allocation9 + $0x18] sm:$0xff]  }
 0x63b   : > { %v1896_v31 = vpack.c.bf16 %v4312_v33, %v4312_v33 }
 0x63d   : > { %1930 = vmatmul.mubr.bf16.vlgmr.msra.gmra.mxu0 %v1896_v31  ;;  %2987 = vmatmul.mubr.bf16.vlgmr.msra.gmra.mxu1 %v1896_v31 }
 0x63e   : > { %2015 = vmatpush1.bf16.msra.mxu0 %v3785_v14  ;;  %2991 = vmatpush3.bf16.msra.mxu1 %v3793_v17  ;;  %v2969_v14 = vpop.f32.mrf.mxu1 }
 0x63f   : > { %2032 = vmatprep.mubr.bf16.mxu0 %v3535_v3  ;;  %2992 = vmatprep.mubr.msk.bf16.mxu1 %vm3537_vm0, %v3536_v5 }
 0x640   : > { %2082 = vmatprep.subr.bf16.mxu0 %v4207_v8  ;;  %2996 = vmatprep.subr.bf16.mxu1 %v3536_v5  ;;  %v1850_v8 = vadd.f32 %v1849_v6, %v3938_v53 }
 0x645   : > { %2675 = vmatmul.mubr.msk.bf16.vlgmr.msra.gmra.mxu0 %vm545_vm2, %v1996_v39  ;;  %2993 = vmatmul.mubr.msk.bf16.vlgmr.msra.gmra.mxu1 %vm545_vm2, %v1996_v39 }
 0x646   : > { %2083 = vmatpush1.bf16.msra.mxu0 %v4219_v1  ;;  %2997 = vmatpush3.bf16.msra.mxu1 %v4222_v43 }
 0x647   : > { %2084 = vmatprep.subr.bf16.mxu0 %v4225_v57  ;;  %2998 = vmatprep.subr.bf16.mxu1 %v3536_v5 }
 0x648   : > { %2114 = vmatprep.mubr.bf16.mxu0 %v3535_v3  ;;  %3012 = vmatprep.mubr.msk.bf16.mxu1 %vm3537_vm0, %v3536_v5 }
 0x64a   : > { %2085 = vmatpush1.bf16.msra.mxu0 %v4232_v50  ;;  %2999 = vmatpush3.bf16.msra.mxu1 %v4235_v55 }
 0x64b   : > { %2086 = vmatprep.subr.bf16.mxu0 %v4238_v56  ;;  %3000 = vmatprep.subr.bf16.mxu1 %v3536_v5 }
 0x64e   : > { %2087 = vmatpush1.bf16.msra.mxu0 %v4242_v44  ;;  %3001 = vmatpush3.bf16.msra.mxu1 %v4245_v58 }
 0x64f   : > { %2088 = vmatprep.subr.bf16.mxu0 %v4248_v59  ;;  %3002 = vmatprep.subr.bf16.mxu1 %v3536_v5 }
 0x652   : > { %2089 = vmatpush1.bf16.msra.mxu0 %v4252_v61  ;;  %3003 = vmatpush3.bf16.msra.mxu1 %v4255_v15  ;;  %v1852_v15 = vadd.f32 %v1851_v34, %v3947_v63 }
 0x653   : > { %2090 = vmatprep.subr.bf16.mxu0 %v4258_v18  ;;  %3004 = vmatprep.subr.bf16.mxu1 %v3536_v5 }
 0x656   : > { %2091 = vmatpush1.bf16.msra.mxu0 %v4262_v19  ;;  %3005 = vmatpush3.bf16.msra.mxu1 %v4265_v20 }
 0x657   : > { %2092 = vmatprep.subr.bf16.mxu0 %v4268_v21  ;;  %3006 = vmatprep.subr.bf16.mxu1 %v3536_v5 }
 0x65a   : > { %2093 = vmatpush1.bf16.msra.mxu0 %v4272_v22  ;;  %3007 = vmatpush3.bf16.msra.mxu1 %v4275_v23 }
 0x65b   : > { %2094 = vmatprep.subr.bf16.mxu0 %v4278_v24  ;;  %3008 = vmatprep.subr.bf16.mxu1 %v3536_v5  ;;  %v1891_v24 = vadd.f32 %v4323_v10, %v3954_v46 }
 0x65e   : > { %2095 = vmatpush1.bf16.msra.mxu0 %v4282_v25  ;;  %3009 = vmatpush3.bf16.msra.mxu1 %v4285_v26 }
 0x65f   : > { %2096 = vmatprep.subr.bf16.mxu0 %v4288_v27  ;;  %3010 = vmatprep.subr.bf16.mxu1 %v3536_v5 }
 0x662   : > { %2097 = vmatpush1.bf16.msra.mxu0 %v4292_v28  ;;  %3011 = vmatpush3.bf16.msra.mxu1 %v4295_v29 }
 0x663   : > { %3016 = vmatprep.subr.bf16.mxu0 %v3536_v5  ;;  %3022 = vmatprep.subr.bf16.mxu1 %v3536_v5 }
 0x6fd   : > { %v1931_v3 = vpop.f32.mrf.mxu0  ;;  %v1972_v17 = vpop.f32.mrf.mxu1 }
 0x6fe   : > { %v1932_v1 = vadd.f32 %v1931_v3, %v3940_v54  ;;  %v1973_v22 = vadd.f32 %v1972_v17, %v3952_v42 }
 0x6ff   : > { %v1933_v43 = vpop.f32.mrf.mxu0  ;;  %v2988_v57 = vpop.f32.mrf.mxu1 }
 0x700   : > { %v1978_v50 = vadd.f32 %v1932_v1, %v1850_v8  ;;  %v1934_v58 = vadd.f32 %v1933_v43, %v3945_v60 }
 0x701   : > { %v1935_v55 = vpop.f32.mrf.mxu0  ;;  %v1975_v56 = vpop.f32.mrf.mxu1 }
 0x702   : > { %v1980_v44 = vmul.f32 0.5, %v1978_v50  ;;  %v1979_v18 = vadd.f32 %v1934_v58, %v1852_v15 }
 0x703   : > { %v1936_v59 = vpop.f32.mrf.mxu0  ;;  %v2989_v61 = vpop.f32.mrf.mxu1 }
 0x704   : > { %3265 = vtanh.f32 %v1980_v44  ;;  %v1981_v19 = vmul.f32 0.5, %v1979_v18 }
 0x705   : > { %v2034_v51 = vpop.f32.mrf.mxu0  ;;  %v2075_v4 = vpop.f32.mrf.mxu1 }
 0x706   : > { %3267 = vtanh.f32 %v1981_v19  ;;  %v2035_v31 = vadd.f32 %v2034_v51, %v3938_v53  ;;  %v2076_v50 = vadd.f32 %v2075_v4, %v3954_v46  ;;  %v3218_v46 = vld [vmem:[#allocation9 + $0x10] sm:$0xff]   ;;  %v3227_v4 = vld [vmem:[#allocation11 + $0x8] sm:$0xff]  }
 0x707   : > { %v2036_v48 = vpop.f32.mrf.mxu0  ;;  %v2994_v7 = vpop.f32.mrf.mxu1  ;;  %v3226_v51 = vld [vmem:[#allocation11 + $0x10] sm:$0xff]  }
 0x708   : > { %v2037_v17 = vadd.f32 %v2036_v48, %v3947_v63  ;;  %v3228_v48 = vld [vmem:[#allocation11] sm:$0xff]   ;;  %v2678_v7 = vld [vmem:[%s4467_s7] ss:$0 sm:$0xff] }
 0x709   : > { %v2038_v9 = vpop.f32.mrf.mxu0  ;;  %v2078_v41 = vpop.f32.mrf.mxu1 }
 0x70b   : > { %v2039_v45 = vpop.f32.mrf.mxu0  ;;  %v2995_v2 = vpop.f32.mrf.mxu1 }
 0x711   : > { %v3266_v20 = vpop.eup %3265 }
 0x712   : > { %v1984_v21 = vadd.f32 1.0, %v3266_v20 }
 0x713   : > { %v3268_v27 = vpop.eup %3267 }
 0x714   : > { %v1986_v23 = vmul.f32 0.5, %v1984_v21  ;;  %v1985_v28 = vadd.f32 1.0, %v3268_v27  ;;  %v3219_v21 = vld [vmem:[#allocation9 + $0x8] sm:$0xff]  }
 0x716   : > { %v1988_v25 = vmul.f32 %v1986_v23, %v1973_v22  ;;  %v1987_v29 = vmul.f32 0.5, %v1985_v28  ;;  %v3220_v22 = vld [vmem:[#allocation9] sm:$0xff]   ;;  %v3221_v23 = vld [vmem:[#allocation11 + $0x38] sm:$0xff]  }
 0x718   : > { %v1989_v26 = vadd.f32 %v1988_v25, %v1891_v24  ;;  %v1991_v13 = vsub.f32 1.0, %v1987_v29  ;;  %v1993_v62 = vmul.f32 %v1987_v29, %v4312_v33  ;;  %v3222_v24 = vld [vmem:[#allocation11 + $0x30] sm:$0xff]   ;;  %v3223_v25 = vld [vmem:[#allocation11 + $0x28] sm:$0xff]  }
 0x71a   : > { %3269 = vtanh.f32 %v1989_v26  ;;  %v2180_v26 = vld [vmem:[#allocation2] sm:$0xf] }
 0x727   : > { %v3270_v40 = vpop.eup %3269 }
 0x728   : > { %v1992_v12 = vmul.f32 %v3270_v40, %v1991_v13 }
 0x72a   : > { %v1994_v49 = vadd.f32 %v1993_v62, %v1992_v12 }
 0x72c   : > { %v2081_v52 = vpack.c.bf16 %v1994_v49, %v1994_v49 }
 0x72e   : > { %2115 = vmatmul.mubr.bf16.vlgmr.msra.gmra.mxu0 %v2081_v52  ;;  %3013 = vmatmul.mubr.bf16.vlgmr.msra.gmra.mxu1 %v2081_v52  ;;  %v3225_v52 = vld [vmem:[#allocation11 + $0x18] sm:$0xff]  }
 0x72f   : > { %3018 = vmatprep.mubr.msk.bf16.mxu0 %vm3537_vm0, %v3536_v5  ;;  %3038 = vmatprep.mubr.msk.bf16.mxu1 %vm3537_vm0, %v3536_v5 }
 0x730   : > { %3023 = vmatpush3.bf16.msra.mxu1 %v3213_v47 }
 0x731   : > { %3024 = vmatprep.subr.bf16.mxu1 %v3536_v5 }
 0x734   : > { %3025 = vmatpush3.bf16.msra.mxu1 %v3214_v16 }
 0x735   : > { %3026 = vmatprep.subr.bf16.mxu1 %v3536_v5 }
 0x738   : > { %3027 = vmatpush3.bf16.msra.mxu1 %v3215_v0 }
 0x739   : > { %3028 = vmatprep.subr.bf16.mxu1 %v3536_v5 }
 0x73c   : > { %3029 = vmatpush3.bf16.msra.mxu1 %v3216_v11 }
 0x73d   : > { %3030 = vmatprep.subr.bf16.mxu1 %v3536_v5 }
 0x740   : > { %3031 = vmatpush3.bf16.msra.mxu1 %v3217_v30 }
 0x741   : > { %3032 = vmatprep.subr.bf16.mxu1 %v3536_v5 }
 0x744   : > { %3033 = vmatpush3.bf16.msra.mxu1 %v3218_v46 }
 0x745   : > { %3034 = vmatprep.subr.bf16.mxu1 %v3536_v5 }
 0x748   : > { %3035 = vmatpush3.bf16.msra.mxu1 %v3219_v21 }
 0x749   : > { %3036 = vmatprep.subr.bf16.mxu1 %v3536_v5 }
 0x74c   : > { %3037 = vmatpush3.bf16.msra.mxu1 %v3220_v22 }
 0x7ee   : > { %v2116_v32 = vpop.f32.mrf.mxu0  ;;  %v2157_v33 = vpop.f32.mrf.mxu1 }
 0x7ef   : > { %v2117_v6 = vadd.f32 %v2116_v32, %v3940_v54  ;;  %v2158_v54 = vadd.f32 %v2157_v33, %v3952_v42  ;;  %v2181_v42 = vld [vmem:[%s4465_s5] sm:$0x3] }
 0x7f0   : > { %v2118_v10 = vpop.f32.mrf.mxu0  ;;  %v3014_v34 = vpop.f32.mrf.mxu1 }
 0x7f1   : > { %v2163_v35 = vadd.f32 %v2117_v6, %v2035_v31  ;;  %v2119_v14 = vadd.f32 %v2118_v10, %v3945_v60 }
 0x7f2   : > { %v2120_v36 = vpop.f32.mrf.mxu0  ;;  %v2160_v37 = vpop.f32.mrf.mxu1 }
 0x7f3   : > { %v2165_v38 = vmul.f32 0.5, %v2163_v35  ;;  %v2164_v8 = vadd.f32 %v2119_v14, %v2037_v17 }
 0x7f4   : > { %v2121_v39 = vpop.f32.mrf.mxu0  ;;  %v3015_v3 = vpop.f32.mrf.mxu1 }
 0x7f5   : > { %3271 = vtanh.f32 %v2165_v38  ;;  %v2166_v1 = vmul.f32 0.5, %v2164_v8 }
 0x7f7   : > { %3273 = vtanh.f32 %v2166_v1 }
 0x802   : > { %v3272_v43 = vpop.eup %3271 }
 0x803   : > { %v2169_v53 = vadd.f32 1.0, %v3272_v43 }
 0x804   : > { %v3274_v44 = vpop.eup %3273 }
 0x805   : > { %v2171_v57 = vmul.f32 0.5, %v2169_v53  ;;  %v2170_v60 = vadd.f32 1.0, %v3274_v44 }
 0x807   : > { %v2173_v55 = vmul.f32 %v2171_v57, %v2158_v54  ;;  %v2172_v58 = vmul.f32 0.5, %v2170_v60 }
 0x809   : > { %v2174_v56 = vadd.f32 %v2173_v55, %v2076_v50  ;;  %v2176_v59 = vsub.f32 1.0, %v2172_v58  ;;  %v2178_v15 = vmul.f32 %v2172_v58, %v1994_v49  ;;  %v3224_v49 = vld [vmem:[#allocation11 + $0x20] sm:$0xff]  }
 0x80b   : > { %3275 = vtanh.f32 %v2174_v56 }
 0x818   : > { %v3276_v61 = vpop.eup %3275 }
 0x819   : > { %v2177_v63 = vmul.f32 %v3276_v61, %v2176_v59 }
 0x81b   : > { %v2179_v18 = vadd.f32 %v2178_v15, %v2177_v63 }
 0x81d   : > { %v2182_v19 = vpack.c.bf16 %v2179_v18, %v2179_v18 }
 0x81f   : > { %v2189_v20 = vsel %vm2187_vm3, %v2182_v19, 0 }
 0x820   : > { %3017 = vmatpush3.bf16.msra.mxu0 %v2189_v20 }
 0x821   : > { %3042 = vmatprep.subr.bf16.mxu0 %v3536_v5 }
 0x823   : > { %3019 = vmatmul.mubr.msk.bf16.vlgmr.msra.gmra.mxu0 %vm2183_vm4, %v2181_v42 }
 0x824   : > { %3058 = vmatprep.mubr.msk.bf16.mxu0 %vm3537_vm0, %v3536_v5  ;;  %3043 = vmatpush3.bf16.msra.mxu0 %v3221_v23 }
 0x825   : > { %3044 = vmatprep.subr.bf16.mxu0 %v3536_v5 }
 0x828   : > { %3045 = vmatpush3.bf16.msra.mxu0 %v3222_v24 }
 0x829   : > { %3046 = vmatprep.subr.bf16.mxu0 %v3536_v5 }
 0x82c   : > { %3047 = vmatpush3.bf16.msra.mxu0 %v3223_v25 }
 0x82d   : > { %3048 = vmatprep.subr.bf16.mxu0 %v3536_v5 }
 0x830   : > { %3049 = vmatpush3.bf16.msra.mxu0 %v3224_v49 }
 0x831   : > { %3050 = vmatprep.subr.bf16.mxu0 %v3536_v5 }
 0x834   : > { %3051 = vmatpush3.bf16.msra.mxu0 %v3225_v52 }
 0x835   : > { %3052 = vmatprep.subr.bf16.mxu0 %v3536_v5 }
 0x838   : > { %3053 = vmatpush3.bf16.msra.mxu0 %v3226_v51 }
 0x839   : > { %3054 = vmatprep.subr.bf16.mxu0 %v3536_v5 }
 0x83c   : > { %3055 = vmatpush3.bf16.msra.mxu0 %v3227_v4 }
 0x83d   : > { %3056 = vmatprep.subr.bf16.mxu0 %v3536_v5  ;;  %v2687_v5 = vld [vmem:[%s4469_s9] ss:$0 sm:$0xff] }
 0x840   : > { %3057 = vmatpush3.bf16.msra.mxu0 %v3228_v48 }
 0x8e3   : > { %v2225_v27 = vpop.f32.mrf.mxu0 }
 0x8e4   : > { %v2231_v28 = vadd.f32 %v2225_v27, %v2180_v26 }
 0x8e5   : > { %v3020_v29 = vpop.f32.mrf.mxu0 }
 0x8e6   : > { %2232 = vst [vmem:[#allocation2] sm:$0xf] %v2231_v28 }
 0x8e7   : > { %v2228_v13 = vpop.f32.mrf.mxu0 }
 0x8e9   : > { %v3021_v40 = vpop.f32.mrf.mxu0 }
 0x8ed   : > { %v2236_v62 = vld [vmem:[#allocation2] sm:$0xf] }
 0x8ee   : > { %v2237_v12 = vpack.c.bf16 %v2236_v62, %v2236_v62 }
 0x8f0   : > { %3039 = vmatmul.mubr.bf16.vlgmr.msra.gmra.mxu1 %v2237_v12 }
 0x9b0   : > { %v2343_v9 = vpop.f32.mrf.mxu1 }
 0x9b1   : > { %v2344_v41 = vadd.f32 %v2678_v7, %v2343_v9 }
 0x9b2   : > { %v3040_v45 = vpop.f32.mrf.mxu1 }
 0x9b3   : > { %3277 = vtanh.f32 %v2344_v41 }
 0x9b4   : > { %v2346_v2 = vpop.f32.mrf.mxu1 }
 0x9b6   : > { %v3041_v47 = vpop.f32.mrf.mxu1 }
 0x9c0   : > { %v3278_v16 = vpop.eup %3277 }
 0x9c1   : > { %v2350_v0 = vpack.c.bf16 %v3278_v16, %v3278_v16 }
 0x9c3   : > { %3059 = vmatmul.mubr.bf16.vlgmr.msra.gmra.mxu0 %v2350_v0 }
 0xa83   : > { %v2456_v11 = vpop.f32.mrf.mxu0 }
 0xa84   : > { %v2457_v30 = vadd.f32 %v2687_v5, %v2456_v11 }
 0xa85   : > { %v3060_v32 = vpop.f32.mrf.mxu0 }
 0xa86   : > { %2462 = vst [vmem:[%s458_s21] sm:$0xf] %v2457_v30 }
 0xa87   : > { %v2459_v33 = vpop.f32.mrf.mxu0 }
 0xa88   : > { %3448 = shalt.err (!%p3445_p9)
}
 0xa89   : > { %s3449_s11 = scalar_lea.hbm %s4412_s30, 64  ;;  %s3453_s12 = scalar_lea.hbm %s4470_s10, 128 }
 0xa8a   : > { %p3450_p10 = scmp.ne.s32.totalorder %s4412_s30, %s3449_s11  ;;  %p3454_p13 = scmp.lt.s32.totalorder %s4412_s30, %s4470_s10 }
 0xa8b   : > { %p3455_p5 = scmp.lt.s32.totalorder %s3453_s12, %s3449_s11 }
 0xa8c   : > { %p3451_p12 = pnand %p3450_p10, %p3724_p2 }
 0xa8d   : > { %p3456_p11 = por %p3455_p5, %p3454_p13 }
 0xa8e   : > { %p3452_p6 = pneg %p3451_p12 }
 0xa90   : > { %p3457_p1 = pnand %p3456_p11, %p3452_p6 }
 0xa92   : > { %3460 = shalt.err (!%p3457_p1)
}
 0xa93   : > { %3080 = dma.vmem_to_hbm [thread:$0]  (%p3724_p2), %s4414_s26, 64, %s4412_s30, %s2464_s24   ;;  %v3061_v31 = vpop.f32.mrf.mxu0 }
 0xa94 PF: > { %s2489_s8 = sand.u32 1, %s3503_s13   ;;  %p4494_p3 = scmp.ne.s32.totalorder %s4492_s29, 0 }
 0xa95   : > { %p4495_p4 = scmp.ge.s32.totalorder %s3523_s18, 2  ;;  %s2490_s20 = scalar_lea.sflag [#allocation5], %s2489_s8 }
 0xa97   : > { %p3100_p0 = pnand %p4495_p4, %p4494_p3 }
 0xa99   : > { %p3101_p8 = pneg %p3100_p0 }
 0xa9b   : > { %3498 = dma.done.wait (%p3101_p8), %s2490_s20, 64  }
 0xa9c   : > { %3500 = vsyncadd (%p3101_p8), %s2490_s20, 4294967232  ;;  %s28_s18 = sadd.s32 1, %s3523_s18   ;;  %s4496_s23 = sld [smem:[#allocation19_spill]] }
 0xa9d   : > { %p25_p7 = scmp.ge.s32.totalorder %s28_s18, 4   ;;  %s4497_s16 = sld [smem:[#allocation17_spill]] }
 0xa9e   : > { %s4498_s17 = sld [smem:[#allocation18_spill]]  ;;  %s4499_s13 = smov %s3507_s14 }
 0xa9f   : > { %s4500_s14 = smov %s3511_s15  ;;  %27 = sbr.rel (!%p25_p7) target bundleno = 13 (0xd), region = 132 }
 0xaa2   : > { %s4501_s15 = smov %s4496_s23 }
 0xaa4   :  { %2495 = vsyncpa [#allocation4], 1 }
 0xaa5   :  { %2497 = vsyncpa [#allocation4 + $0x1], 1 }
 0xaa6   :  { %2498 = vsyncpa [#allocation7], 1 }
 0xaa7   :  { %2499 = vsyncpa [#allocation10], 1 }
 0xaa8   :  { %2500 = vsyncpa [#allocation5], 1 }
 0xaa9   :  { %2502 = vsyncpa [#allocation5 + $0x1], 1 }

</bundles_post_ra>
